<compile_context>
chip_gen: v7x
topology: tpu7x:2x2x1
jax: 0.10.0
libtpu: 0.0.40
codegen_flags: <defaults>
</compile_context>

<pallas_src>
import math

import jax
import jax.numpy as jnp
from jax import lax
from jax.experimental import pallas as pl
from jax.experimental.pallas import tpu as pltpu

# ----------------------- small, CEDA-consistent dimensions -----------------------
N_USERS   = 8      # number of users in the cascade / batch
ATTR_DIM  = 16     # user attribute dimension
HIDDEN    = 32     # config.hidden_dim
NUM_HEADS = 4      # config.num_heads
HEAD_DIM  = HIDDEN // NUM_HEADS
MAX_SEQ   = 16     # max_seq_len for positional encoding
NUM_CAT   = 8      # num_categories
LN_EPS    = 1e-5   # PyTorch nn.LayerNorm default eps
FF_DIM    = 4 * HIDDEN          # 128
OUT_LANES = 128                 # single lane-dense output tile


# ------------------------------- parameter slab layout -------------------------------
def _round8(n):
    return ((n + 7) // 8) * 8


# every block starts on an 8-row boundary; values occupy the leading lanes of the slab.
_S32_BLOCKS = [                      # 32-lane slab
    ("w_attr", ATTR_DIM), ("b_attr", 1),
    ("we_a", HIDDEN), ("we_p", HIDDEN), ("b_we", 1),
    ("mlp_w1", 3 * HIDDEN), ("mlp_b1", 3),
    ("mlp_w2", 3 * HIDDEN), ("mlp_b2", 3),
    ("proj_w", 4 * HIDDEN), ("proj_b", 4),
    ("ff_w2", FF_DIM), ("ff_b2", 1),
    ("ln_w", 2), ("ln_b", 2),
    ("diff_w1s", HIDDEN), ("diff_w1t", HIDDEN), ("diff_b1", 1),
    ("diff_w2", HIDDEN), ("diff_b2", 1),
    ("cat_w", HIDDEN), ("cat_b", 1),
    ("pe", MAX_SEQ),
    ("g_head", HIDDEN), ("e_head", HIDDEN),
    ("ri", N_USERS * N_USERS), ("rj", N_USERS * N_USERS),
]
_S128_BLOCKS = [                     # 128-lane slab
    ("ff_w1", HIDDEN), ("ff_b1", 1),
    ("p_all", HIDDEN), ("bs", N_USERS),
]


def _layout(blocks):
    offs, row = {}, 0
    for name, rows in blocks:
        offs[name] = row
        row += _round8(rows)
    return offs, row


OFF32, ROWS32 = _layout(_S32_BLOCKS)        # ROWS32 = 952
OFF128, ROWS128 = _layout(_S128_BLOCKS)     # ROWS128 = 80


# =====================================================================================
# Fused kernel: UserDualModelling + CausalTransformer + SocialDiffusionPredictor
# =====================================================================================
def _ceda_fused_kernel(pos_ref, attr_ref, obs_ref, s32_ref, s128_ref, out_ref):
    f32 = jnp.float32

    def w32(name, rows, idx=0):
        off = OFF32[name] + idx * rows
        return s32_ref[off:off + rows, :]

    def b32(name, idx=0):
        off = OFF32[name] + idx
        return s32_ref[off:off + 1, :]

    def w128(name, rows):
        off = OFF128[name]
        return s128_ref[off:off + rows, :]

    # single lane-dense output tile; zero once, fill sub-ranges below.
    out_ref[...] = jnp.zeros((N_USERS, OUT_LANES), f32)

    # ------------------------- Component 1: UserDualModelling -------------------------
    # positional gather fused into the kernel: one-hot(positions) @ PE table
    onehot = (lax.broadcasted_iota(jnp.int32, (N_USERS, MAX_SEQ), 1)
              == pos_ref[...]).astype(f32)                                    # (N, S)
    pos_embeds = jnp.dot(onehot, w32("pe", MAX_SEQ), preferred_element_type=f32)

    attr_embeds = jnp.dot(attr_ref[...], w32("w_attr", ATTR_DIM),
                          preferred_element_type=f32) + b32("b_attr")
    comp = (jnp.dot(attr_embeds, w32("we_a", HIDDEN), preferred_element_type=f32)
            + jnp.dot(pos_embeds, w32("we_p", HIDDEN), preferred_element_type=f32)
            + b32("b_we"))
    out_ref[:, 0:HIDDEN] = comp

    # ------------------------- Component 2: CausalTransformer -------------------------
    def mlp2(x, idx):                  # 0 predictor, 1 observation_mapper, 2 residual_mlp
        h = jnp.dot(x, w32("mlp_w1", HIDDEN, idx), preferred_element_type=f32) \
            + b32("mlp_b1", idx)
        h = jnp.maximum(h, 0.0)                                               # ReLU
        return jnp.dot(h, w32("mlp_w2", HIDDEN, idx), preferred_element_type=f32) \
            + b32("mlp_b2", idx)

    def proj(x, idx):                  # 0 query, 1 key, 2 value, 3 output
        return jnp.dot(x, w32("proj_w", HIDDEN, idx), preferred_element_type=f32) \
            + b32("proj_b", idx)

    residual = mlp2(mlp2(comp, 0) - mlp2(obs_ref[...], 1), 2)
    q, k, v = proj(comp, 0), proj(comp, 1), proj(comp, 2)

    # Per-user attention over heads (torch view (N, nh, dh)):
    #   scores[n, h, g] = <Q_nh, K_ng>/sqrt(dh) - <Q_nh, R_ng>
    # g is enumerated via head shifts s; a single packed (H, nh*H) matrix produces all
    # lane-shifted copies of (k/sqrt(dh) - r) and of v with one matmul each.
    kmr_all = jnp.dot(k * (1.0 / math.sqrt(HEAD_DIM)) - residual,
                      w128("p_all", HIDDEN), preferred_element_type=f32)      # (N, nh*H)
    v_all = jnp.dot(v, w128("p_all", HIDDEN), preferred_element_type=f32)     # (N, nh*H)

    g_head = w32("g_head", HIDDEN)   # (H, H): per-head lane-sum gather (cols >= nh are 0)
    e_head = w32("e_head", HIDDEN)   # (H, H): per-head broadcast to lanes (rows >= nh are 0)

    scores, v_shift = [], []
    for s in range(NUM_HEADS):
        lo = s * HIDDEN
        v_shift.append(v_all[:, lo:lo + HIDDEN])
        scores.append(jnp.dot(q * kmr_all[:, lo:lo + HIDDEN], g_head,
                              preferred_element_type=f32))                    # (N, H)

    m = scores[0]
    for s in range(1, NUM_HEADS):
        m = jnp.maximum(m, scores[s])
    p = [jnp.exp(sc - m) for sc in scores]
    denom = p[0]
    for s in range(1, NUM_HEADS):
        denom = denom + p[s]
    inv_denom = pl.reciprocal(denom, approx=True)      # softmax over g; dropout = identity

    ctx = jnp.zeros((N_USERS, HIDDEN), f32)
    for s in range(NUM_HEADS):
        ctx = ctx + jnp.dot(p[s] * inv_denom, e_head,
                            preferred_element_type=f32) * v_shift[s]
    attended = proj(ctx, 3)                                                   # output_proj

    def layer_norm(x, idx):
        mu = jnp.mean(x, axis=-1, keepdims=True)
        var = jnp.mean((x - mu) ** 2, axis=-1, keepdims=True)
        return (x - mu) * lax.rsqrt(var + LN_EPS) * b32("ln_w", idx) + b32("ln_b", idx)

    x1 = layer_norm(comp + attended, 0)                                       # layer_norm1

    hff = jnp.dot(x1, w128("ff_w1", HIDDEN), preferred_element_type=f32) + w128("ff_b1", 1)
    hff = jnp.where(hff > 0, hff, 0.01 * hff)                                 # LeakyReLU(0.01)
    ffo = jnp.dot(hff, w32("ff_w2", FF_DIM), preferred_element_type=f32) + b32("ff_b2")

    unb = layer_norm(x1 + ffo, 1)                                             # layer_norm2
    out_ref[:, HIDDEN:2 * HIDDEN] = unb

    # --------------------- Component 3: SocialDiffusionPredictor ---------------------
    # p[i, j] = sigmoid(w2 . relu(unb_i @ W1s + unb_j @ W1t + b1) + b2), batched as one
    # (N*N, H) block with row r = (i=r//N, j=r%N).
    a = jnp.dot(unb, w32("diff_w1s", HIDDEN), preferred_element_type=f32)     # (N, H)
    b = jnp.dot(unb, w32("diff_w1t", HIDDEN), preferred_element_type=f32)     # (N, H)
    ri = s32_ref[OFF32["ri"]:OFF32["ri"] + N_USERS * N_USERS, 0:N_USERS]      # (N*N, N)
    rj = s32_ref[OFF32["rj"]:OFF32["rj"] + N_USERS * N_USERS, 0:N_USERS]      # (N*N, N)
    h_pair = jnp.maximum(jnp.dot(ri, a, preferred_element_type=f32)
                         + jnp.dot(rj, b, preferred_element_type=f32)
                         + b32("diff_b1"), 0.0)                               # (N*N, H)
    w2_col = s32_ref[OFF32["diff_w2"]:OFF32["diff_w2"] + HIDDEN, 0:1]         # (H, 1)
    z = jnp.dot(h_pair, w2_col, preferred_element_type=f32)                   # (N*N, 1)
    bs = s128_ref[OFF128["bs"]:OFF128["bs"] + N_USERS, 0:N_USERS * N_USERS]   # (N, N*N)
    b2 = s32_ref[OFF32["diff_b2"]:OFF32["diff_b2"] + 1, 0:1]                  # (1, 1)
    logits = jnp.dot(bs, z * rj, preferred_element_type=f32) + b2             # (N, N)
    out_ref[:, 2 * HIDDEN:2 * HIDDEN + N_USERS] = jax.nn.sigmoid(logits)

    # intra-list diversity from pairwise cosine similarity
    nrm = jnp.sqrt(jnp.sum(unb * unb, axis=-1, keepdims=True))
    en = unb * pl.reciprocal(jnp.maximum(nrm, 1e-8), approx=True)
    sim = lax.dot_general(en, en, (((1,), (1,)), ((), ())),
                          preferred_element_type=f32)                         # (N, N)
    n = float(N_USERS)
    sim_total = jnp.sum(jnp.sum(sim, axis=1, keepdims=True), axis=0, keepdims=True)
    ild = 1.0 - (sim_total - n) / (n * (n - 1.0))                             # (1, 1)

    # category coverage (cat_w / cat_b zero-padded to 32 lanes -> padded lanes stay at 0.5)
    cats = jax.nn.sigmoid(jnp.dot(unb, w32("cat_w", HIDDEN), preferred_element_type=f32)
                          + b32("cat_b"))
    cover = jnp.sum((cats > 0.5).astype(f32), axis=0, keepdims=True)
    cc = jnp.sum((cover > 0.0).astype(f32), axis=1, keepdims=True) / float(NUM_CAT)

    lane = lax.broadcasted_iota(jnp.int32, (1, N_USERS), 1)
    metrics = jnp.where(lane == 0, ild, jnp.where(lane == 1, cc, 0.0))        # (1, N)
    out_ref[0:1, 2 * HIDDEN + N_USERS:2 * HIDDEN + 2 * N_USERS] = metrics


# =====================================================================================
# Wrapper / glue
# =====================================================================================
def _vmem_spec():
    return pl.BlockSpec(memory_space=pltpu.MemorySpace.VMEM)


def make_pos_encoding(max_seq_len, dim):
    position = jnp.arange(max_seq_len, dtype=jnp.float32)[:, None]
    div_term = jnp.exp(jnp.arange(0, dim, 2, dtype=jnp.float32) * (-math.log(10000.0) / dim))
    pe = jnp.zeros((max_seq_len, dim), jnp.float32)
    pe = pe.at[:, 0::2].set(jnp.sin(position * div_term))
    pe = pe.at[:, 1::2].set(jnp.cos(position * div_term))
    return pe


def _const_matrices():
    f32 = jnp.float32
    d = jnp.arange(HIDDEN)
    g_head = (d[:, None] // HEAD_DIM == d[None, :]).astype(f32)           # (H, H)
    e_head = g_head.T                                                     # (H, H)
    col = jnp.arange(NUM_HEADS * HIDDEN)
    src_lane = (col % HIDDEN + (col // HIDDEN) * HEAD_DIM) % HIDDEN
    p_all = (d[:, None] == src_lane[None, :]).astype(f32)                 # (H, nh*H)
    r = jnp.arange(N_USERS * N_USERS)
    j = jnp.arange(N_USERS)
    ri = (r[:, None] // N_USERS == j[None, :]).astype(f32)                # (N*N, N)
    rj = (r[:, None] % N_USERS == j[None, :]).astype(f32)                 # (N*N, N)
    bs = (j[:, None] == r[None, :] // N_USERS).astype(f32)                # (N, N*N)
    return g_head, e_head, p_all, ri, rj, bs


def init_params(key):
    keys = iter(jax.random.split(key, 24))

    def lin_w(shape):
        fan_in = shape[-2]
        return jax.random.normal(next(keys), shape, jnp.float32) / math.sqrt(fan_in)

    def lin_b(shape):
        return jax.random.normal(next(keys), shape, jnp.float32) * 0.01

    return dict(
        # UserDualModelling
        w_attr=lin_w((ATTR_DIM, HIDDEN)), b_attr=lin_b((1, HIDDEN)),
        we_a=lin_w((HIDDEN, HIDDEN)), we_p=lin_w((HIDDEN, HIDDEN)), b_we=lin_b((1, HIDDEN)),
        # CausalTransformer: stacked MLPs (predictor / observation_mapper / residual_mlp)
        mlp_w1=lin_w((3, HIDDEN, HIDDEN)), mlp_b1=lin_b((3, HIDDEN)),
        mlp_w2=lin_w((3, HIDDEN, HIDDEN)), mlp_b2=lin_b((3, HIDDEN)),
        # q / k / v / output projections
        proj_w=lin_w((4, HIDDEN, HIDDEN)), proj_b=lin_b((4, HIDDEN)),
        # feed-forward + layernorms
        ff_w1=lin_w((HIDDEN, FF_DIM)), ff_b1=lin_b((1, FF_DIM)),
        ff_w2=lin_w((FF_DIM, HIDDEN)), ff_b2=lin_b((1, HIDDEN)),
        ln_w=jnp.ones((2, HIDDEN), jnp.float32), ln_b=jnp.zeros((2, HIDDEN), jnp.float32),
        # SocialDiffusionPredictor (diff_w2 stored as a (HIDDEN, 1) column)
        diff_w1s=lin_w((HIDDEN, HIDDEN)), diff_w1t=lin_w((HIDDEN, HIDDEN)),
        diff_b1=lin_b((1, HIDDEN)),
        diff_w2=jax.random.normal(next(keys), (HIDDEN, 1), jnp.float32) / math.sqrt(HIDDEN),
        diff_b2=jnp.zeros((1, 1), jnp.float32),
        cat_w=lin_w((HIDDEN, NUM_CAT)), cat_b=lin_b((1, NUM_CAT)),
    )


def pack_params(params):
    """Pack all parameters + constant helper matrices into two contiguous slabs (one-time)."""
    f32 = jnp.float32
    g_head, e_head, p_all, ri, rj, bs = _const_matrices()

    def fill(slab, offs, name, val):
        r, c = val.shape
        return slab.at[offs[name]:offs[name] + r, :c].set(val.astype(f32))

    s32 = jnp.zeros((ROWS32, HIDDEN), f32)
    for name, val in {
        "w_attr": params["w_attr"], "b_attr": params["b_attr"],
        "we_a": params["we_a"], "we_p": params["we_p"], "b_we": params["b_we"],
        "mlp_w1": params["mlp_w1"].reshape(3 * HIDDEN, HIDDEN), "mlp_b1": params["mlp_b1"],
        "mlp_w2": params["mlp_w2"].reshape(3 * HIDDEN, HIDDEN), "mlp_b2": params["mlp_b2"],
        "proj_w": params["proj_w"].reshape(4 * HIDDEN, HIDDEN), "proj_b": params["proj_b"],
        "ff_w2": params["ff_w2"], "ff_b2": params["ff_b2"],
        "ln_w": params["ln_w"], "ln_b": params["ln_b"],
        "diff_w1s": params["diff_w1s"], "diff_w1t": params["diff_w1t"],
        "diff_b1": params["diff_b1"], "diff_w2": params["diff_w2"],
        "diff_b2": params["diff_b2"], "cat_w": params["cat_w"], "cat_b": params["cat_b"],
        "pe": make_pos_encoding(MAX_SEQ, HIDDEN),
        "g_head": g_head, "e_head": e_head, "ri": ri, "rj": rj,
    }.items():
        s32 = fill(s32, OFF32, name, val)

    s128 = jnp.zeros((ROWS128, FF_DIM), f32)
    for name, val in {"ff_w1": params["ff_w1"], "ff_b1": params["ff_b1"],
                      "p_all": p_all, "bs": bs}.items():
        s128 = fill(s128, OFF128, name, val)
    return s32, s128


@jax.jit
def ceda_forward(user_attributes, positions, observations, slab32, slab128):
    pos2d = positions.astype(jnp.int32).reshape(N_USERS, 1)

    packed = pl.pallas_call(
        _ceda_fused_kernel,
        out_shape=jax.ShapeDtypeStruct((N_USERS, OUT_LANES), jnp.float32),
        in_specs=[_vmem_spec() for _ in range(5)],
        out_specs=_vmem_spec(),
    )(pos2d, user_attributes, observations, slab32, slab128)

    probs = packed[:, 2 * HIDDEN:2 * HIDDEN + N_USERS]
    return {
        "comprehensive_embeds": packed[:, 0:HIDDEN],
        "unbiased_embeds": packed[:, HIDDEN:2 * HIDDEN],
        "diffusion_probs": probs[:, :, None],   # (N, N, 1) pairwise diffusion probabilities
        "ild_score": packed[0, 2 * HIDDEN + N_USERS],
        "cc_score": packed[0, 2 * HIDDEN + N_USERS + 1],
        # TODO(synk): networkx-based TargetedInterventions have no tensor/Pallas equivalent;
        # graph=None path of the reference forward is reproduced (modified_graph = None).
        "modified_graph": None,
    }


if __name__ == "__main__":
    key = jax.random.PRNGKey(0)
    k_attr, k_pos, k_obs, k_params = jax.random.split(key, 4)

    user_attributes = jax.random.normal(k_attr, (N_USERS, ATTR_DIM), jnp.float32)
    positions = jax.random.randint(k_pos, (N_USERS,), 0, MAX_SEQ, dtype=jnp.int32)
    observations = jax.random.normal(k_obs, (N_USERS, HIDDEN), jnp.float32)
    params = init_params(k_params)
    slab32, slab128 = pack_params(params)

    out = ceda_forward(user_attributes, positions, observations, slab32, slab128)
    jax.block_until_ready(out)
    print("KERNEL_OK")
</pallas_src>

<mosaic_0001>
module attributes {stable_mosaic.version = 11 : i64} {
  func.func @_ceda_fused_kernel(%arg0: memref<8x1xi32, #tpu.memory_space<vmem>>, %arg1: memref<8x16xf32, #tpu.memory_space<vmem>>, %arg2: memref<8x32xf32, #tpu.memory_space<vmem>>, %arg3: memref<952x32xf32, #tpu.memory_space<vmem>>, %arg4: memref<80x128xf32, #tpu.memory_space<vmem>>, %arg5: memref<8x128xf32, #tpu.memory_space<vmem>>) attributes {dimension_semantics = [], scalar_prefetch = 0 : i64, scratch_operands = 0 : i64, tpu.core_type = #tpu.core_type<tc>} {
    %cst = arith.constant 0.000000e+00 : f32
    %0 = vector.broadcast %cst : f32 to vector<8x128xf32>
    %c0 = arith.constant 0 : index
    %c0_0 = arith.constant 0 : index
    %1 = vector.load %arg5[%c0, %c0_0] : memref<8x128xf32, #tpu.memory_space<vmem>>, vector<8x128xf32>
    tpu.vector_store %arg5[%c0, %c0_0], %0 {strides = array<i32>} : memref<8x128xf32, #tpu.memory_space<vmem>>, vector<8x128xf32>,
    %2 = tpu.iota {dimensions = array<i32: 1>} : vector<8x16xi32>
    %c0_1 = arith.constant 0 : index
    %c0_2 = arith.constant 0 : index
    %3 = vector.load %arg0[%c0_1, %c0_2] : memref<8x1xi32, #tpu.memory_space<vmem>>, vector<8x1xi32>
    %4 = vector.broadcast %3 : vector<8x1xi32> to vector<8x16xi32>
    %5 = arith.cmpi eq, %2, %4 : vector<8x16xi32>
    %6 = arith.extui %5 : vector<8x16xi1> to vector<8x16xi32>
    %7 = arith.sitofp %6 : vector<8x16xi32> to vector<8x16xf32>
    %c744 = arith.constant 744 : index
    %c0_3 = arith.constant 0 : index
    %8 = vector.load %arg3[%c744, %c0_3] : memref<952x32xf32, #tpu.memory_space<vmem>>, vector<16x32xf32>
    %cst_4 = arith.constant dense<0.000000e+00> : vector<8x32xf32>
    %9 = tpu.matmul %7, %8, %cst_4 {dimension_numbers = #tpu.dot_dimension_numbers<[1], [0], [0], [1], [0, 0, 1, 1], [], []>} : vector<8x16xf32>, vector<16x32xf32>, vector<8x32xf32> -> vector<8x32xf32>
    %c0_5 = arith.constant 0 : index
    %c0_6 = arith.constant 0 : index
    %10 = vector.load %arg1[%c0_5, %c0_6] : memref<8x16xf32, #tpu.memory_space<vmem>>, vector<8x16xf32>
    %c0_7 = arith.constant 0 : index
    %c0_8 = arith.constant 0 : index
    %11 = vector.load %arg3[%c0_7, %c0_8] : memref<952x32xf32, #tpu.memory_space<vmem>>, vector<16x32xf32>
    %cst_9 = arith.constant dense<0.000000e+00> : vector<8x32xf32>
    %12 = tpu.matmul %10, %11, %cst_9 {dimension_numbers = #tpu.dot_dimension_numbers<[1], [0], [0], [1], [0, 0, 1, 1], [], []>} : vector<8x16xf32>, vector<16x32xf32>, vector<8x32xf32> -> vector<8x32xf32>
    %c16 = arith.constant 16 : index
    %c0_10 = arith.constant 0 : index
    %13 = vector.load %arg3[%c16, %c0_10] : memref<952x32xf32, #tpu.memory_space<vmem>>, vector<1x32xf32>
    %14 = vector.broadcast %13 : vector<1x32xf32> to vector<8x32xf32>
    %15 = arith.addf %12, %14 : vector<8x32xf32>
    %c24 = arith.constant 24 : index
    %c0_11 = arith.constant 0 : index
    %16 = vector.load %arg3[%c24, %c0_11] : memref<952x32xf32, #tpu.memory_space<vmem>>, vector<32x32xf32>
    %cst_12 = arith.constant dense<0.000000e+00> : vector<8x32xf32>
    %17 = tpu.matmul %15, %16, %cst_12 {dimension_numbers = #tpu.dot_dimension_numbers<[1], [0], [0], [1], [0, 0, 1, 1], [], []>} : vector<8x32xf32>, vector<32x32xf32>, vector<8x32xf32> -> vector<8x32xf32>
    %c56 = arith.constant 56 : index
    %c0_13 = arith.constant 0 : index
    %18 = vector.load %arg3[%c56, %c0_13] : memref<952x32xf32, #tpu.memory_space<vmem>>, vector<32x32xf32>
    %cst_14 = arith.constant dense<0.000000e+00> : vector<8x32xf32>
    %19 = tpu.matmul %9, %18, %cst_14 {dimension_numbers = #tpu.dot_dimension_numbers<[1], [0], [0], [1], [0, 0, 1, 1], [], []>} : vector<8x32xf32>, vector<32x32xf32>, vector<8x32xf32> -> vector<8x32xf32>
    %20 = arith.addf %17, %19 : vector<8x32xf32>
    %c88 = arith.constant 88 : index
    %c0_15 = arith.constant 0 : index
    %21 = vector.load %arg3[%c88, %c0_15] : memref<952x32xf32, #tpu.memory_space<vmem>>, vector<1x32xf32>
    %22 = vector.broadcast %21 : vector<1x32xf32> to vector<8x32xf32>
    %23 = arith.addf %20, %22 : vector<8x32xf32>
    %c0_16 = arith.constant 0 : index
    %c0_17 = arith.constant 0 : index
    %24 = vector.load %arg5[%c0_16, %c0_17] : memref<8x128xf32, #tpu.memory_space<vmem>>, vector<8x32xf32>
    tpu.vector_store %arg5[%c0_16, %c0_17], %23 {strides = array<i32>} : memref<8x128xf32, #tpu.memory_space<vmem>>, vector<8x32xf32>,
    %c96 = arith.constant 96 : index
    %c0_18 = arith.constant 0 : index
    %25 = vector.load %arg3[%c96, %c0_18] : memref<952x32xf32, #tpu.memory_space<vmem>>, vector<32x32xf32>
    %cst_19 = arith.constant dense<0.000000e+00> : vector<8x32xf32>
    %26 = tpu.matmul %23, %25, %cst_19 {dimension_numbers = #tpu.dot_dimension_numbers<[1], [0], [0], [1], [0, 0, 1, 1], [], []>} : vector<8x32xf32>, vector<32x32xf32>, vector<8x32xf32> -> vector<8x32xf32>
    %c192 = arith.constant 192 : index
    %c0_20 = arith.constant 0 : index
    %27 = vector.load %arg3[%c192, %c0_20] : memref<952x32xf32, #tpu.memory_space<vmem>>, vector<1x32xf32>
    %28 = vector.broadcast %27 : vector<1x32xf32> to vector<8x32xf32>
    %29 = arith.addf %26, %28 : vector<8x32xf32>
    %cst_21 = arith.constant 0.000000e+00 : f32
    %30 = vector.broadcast %cst_21 : f32 to vector<8x32xf32>
    %31 = arith.maximumf %29, %30 : vector<8x32xf32>
    %c200 = arith.constant 200 : index
    %c0_22 = arith.constant 0 : index
    %32 = vector.load %arg3[%c200, %c0_22] : memref<952x32xf32, #tpu.memory_space<vmem>>, vector<32x32xf32>
    %cst_23 = arith.constant dense<0.000000e+00> : vector<8x32xf32>
    %33 = tpu.matmul %31, %32, %cst_23 {dimension_numbers = #tpu.dot_dimension_numbers<[1], [0], [0], [1], [0, 0, 1, 1], [], []>} : vector<8x32xf32>, vector<32x32xf32>, vector<8x32xf32> -> vector<8x32xf32>
    %c296 = arith.constant 296 : index
    %c0_24 = arith.constant 0 : index
    %34 = vector.load %arg3[%c296, %c0_24] : memref<952x32xf32, #tpu.memory_space<vmem>>, vector<1x32xf32>
    %35 = vector.broadcast %34 : vector<1x32xf32> to vector<8x32xf32>
    %36 = arith.addf %33, %35 : vector<8x32xf32>
    %c0_25 = arith.constant 0 : index
    %c0_26 = arith.constant 0 : index
    %37 = vector.load %arg2[%c0_25, %c0_26] : memref<8x32xf32, #tpu.memory_space<vmem>>, vector<8x32xf32>
    %c128 = arith.constant 128 : index
    %c0_27 = arith.constant 0 : index
    %38 = vector.load %arg3[%c128, %c0_27] : memref<952x32xf32, #tpu.memory_space<vmem>>, vector<32x32xf32>
    %cst_28 = arith.constant dense<0.000000e+00> : vector<8x32xf32>
    %39 = tpu.matmul %37, %38, %cst_28 {dimension_numbers = #tpu.dot_dimension_numbers<[1], [0], [0], [1], [0, 0, 1, 1], [], []>} : vector<8x32xf32>, vector<32x32xf32>, vector<8x32xf32> -> vector<8x32xf32>
    %c193 = arith.constant 193 : index
    %c0_29 = arith.constant 0 : index
    %40 = vector.load %arg3[%c193, %c0_29] : memref<952x32xf32, #tpu.memory_space<vmem>>, vector<1x32xf32>
    %41 = vector.broadcast %40 : vector<1x32xf32> to vector<8x32xf32>
    %42 = arith.addf %39, %41 : vector<8x32xf32>
    %cst_30 = arith.constant 0.000000e+00 : f32
    %43 = vector.broadcast %cst_30 : f32 to vector<8x32xf32>
    %44 = arith.maximumf %42, %43 : vector<8x32xf32>
    %c232 = arith.constant 232 : index
    %c0_31 = arith.constant 0 : index
    %45 = vector.load %arg3[%c232, %c0_31] : memref<952x32xf32, #tpu.memory_space<vmem>>, vector<32x32xf32>
    %cst_32 = arith.constant dense<0.000000e+00> : vector<8x32xf32>
    %46 = tpu.matmul %44, %45, %cst_32 {dimension_numbers = #tpu.dot_dimension_numbers<[1], [0], [0], [1], [0, 0, 1, 1], [], []>} : vector<8x32xf32>, vector<32x32xf32>, vector<8x32xf32> -> vector<8x32xf32>
    %c297 = arith.constant 297 : index
    %c0_33 = arith.constant 0 : index
    %47 = vector.load %arg3[%c297, %c0_33] : memref<952x32xf32, #tpu.memory_space<vmem>>, vector<1x32xf32>
    %48 = vector.broadcast %47 : vector<1x32xf32> to vector<8x32xf32>
    %49 = arith.addf %46, %48 : vector<8x32xf32>
    %50 = arith.subf %36, %49 : vector<8x32xf32>
    %c160 = arith.constant 160 : index
    %c0_34 = arith.constant 0 : index
    %51 = vector.load %arg3[%c160, %c0_34] : memref<952x32xf32, #tpu.memory_space<vmem>>, vector<32x32xf32>
    %cst_35 = arith.constant dense<0.000000e+00> : vector<8x32xf32>
    %52 = tpu.matmul %50, %51, %cst_35 {dimension_numbers = #tpu.dot_dimension_numbers<[1], [0], [0], [1], [0, 0, 1, 1], [], []>} : vector<8x32xf32>, vector<32x32xf32>, vector<8x32xf32> -> vector<8x32xf32>
    %c194 = arith.constant 194 : index
    %c0_36 = arith.constant 0 : index
    %53 = vector.load %arg3[%c194, %c0_36] : memref<952x32xf32, #tpu.memory_space<vmem>>, vector<1x32xf32>
    %54 = vector.broadcast %53 : vector<1x32xf32> to vector<8x32xf32>
    %55 = arith.addf %52, %54 : vector<8x32xf32>
    %cst_37 = arith.constant 0.000000e+00 : f32
    %56 = vector.broadcast %cst_37 : f32 to vector<8x32xf32>
    %57 = arith.maximumf %55, %56 : vector<8x32xf32>
    %c264 = arith.constant 264 : index
    %c0_38 = arith.constant 0 : index
    %58 = vector.load %arg3[%c264, %c0_38] : memref<952x32xf32, #tpu.memory_space<vmem>>, vector<32x32xf32>
    %cst_39 = arith.constant dense<0.000000e+00> : vector<8x32xf32>
    %59 = tpu.matmul %57, %58, %cst_39 {dimension_numbers = #tpu.dot_dimension_numbers<[1], [0], [0], [1], [0, 0, 1, 1], [], []>} : vector<8x32xf32>, vector<32x32xf32>, vector<8x32xf32> -> vector<8x32xf32>
    %c298 = arith.constant 298 : index
    %c0_40 = arith.constant 0 : index
    %60 = vector.load %arg3[%c298, %c0_40] : memref<952x32xf32, #tpu.memory_space<vmem>>, vector<1x32xf32>
    %61 = vector.broadcast %60 : vector<1x32xf32> to vector<8x32xf32>
    %62 = arith.addf %59, %61 : vector<8x32xf32>
    %c304 = arith.constant 304 : index
    %c0_41 = arith.constant 0 : index
    %63 = vector.load %arg3[%c304, %c0_41] : memref<952x32xf32, #tpu.memory_space<vmem>>, vector<32x32xf32>
    %cst_42 = arith.constant dense<0.000000e+00> : vector<8x32xf32>
    %64 = tpu.matmul %23, %63, %cst_42 {dimension_numbers = #tpu.dot_dimension_numbers<[1], [0], [0], [1], [0, 0, 1, 1], [], []>} : vector<8x32xf32>, vector<32x32xf32>, vector<8x32xf32> -> vector<8x32xf32>
    %c432 = arith.constant 432 : index
    %c0_43 = arith.constant 0 : index
    %65 = vector.load %arg3[%c432, %c0_43] : memref<952x32xf32, #tpu.memory_space<vmem>>, vector<1x32xf32>
    %66 = vector.broadcast %65 : vector<1x32xf32> to vector<8x32xf32>
    %67 = arith.addf %64, %66 : vector<8x32xf32>
    %c336 = arith.constant 336 : index
    %c0_44 = arith.constant 0 : index
    %68 = vector.load %arg3[%c336, %c0_44] : memref<952x32xf32, #tpu.memory_space<vmem>>, vector<32x32xf32>
    %cst_45 = arith.constant dense<0.000000e+00> : vector<8x32xf32>
    %69 = tpu.matmul %23, %68, %cst_45 {dimension_numbers = #tpu.dot_dimension_numbers<[1], [0], [0], [1], [0, 0, 1, 1], [], []>} : vector<8x32xf32>, vector<32x32xf32>, vector<8x32xf32> -> vector<8x32xf32>
    %c433 = arith.constant 433 : index
    %c0_46 = arith.constant 0 : index
    %70 = vector.load %arg3[%c433, %c0_46] : memref<952x32xf32, #tpu.memory_space<vmem>>, vector<1x32xf32>
    %71 = vector.broadcast %70 : vector<1x32xf32> to vector<8x32xf32>
    %72 = arith.addf %69, %71 : vector<8x32xf32>
    %c368 = arith.constant 368 : index
    %c0_47 = arith.constant 0 : index
    %73 = vector.load %arg3[%c368, %c0_47] : memref<952x32xf32, #tpu.memory_space<vmem>>, vector<32x32xf32>
    %cst_48 = arith.constant dense<0.000000e+00> : vector<8x32xf32>
    %74 = tpu.matmul %23, %73, %cst_48 {dimension_numbers = #tpu.dot_dimension_numbers<[1], [0], [0], [1], [0, 0, 1, 1], [], []>} : vector<8x32xf32>, vector<32x32xf32>, vector<8x32xf32> -> vector<8x32xf32>
    %c434 = arith.constant 434 : index
    %c0_49 = arith.constant 0 : index
    %75 = vector.load %arg3[%c434, %c0_49] : memref<952x32xf32, #tpu.memory_space<vmem>>, vector<1x32xf32>
    %76 = vector.broadcast %75 : vector<1x32xf32> to vector<8x32xf32>
    %77 = arith.addf %74, %76 : vector<8x32xf32>
    %cst_50 = arith.constant 0.353553385 : f32
    %78 = vector.broadcast %cst_50 : f32 to vector<8x32xf32>
    %79 = arith.mulf %72, %78 : vector<8x32xf32>
    %80 = arith.subf %79, %62 : vector<8x32xf32>
    %c40 = arith.constant 40 : index
    %c0_51 = arith.constant 0 : index
    %81 = vector.load %arg4[%c40, %c0_51] : memref<80x128xf32, #tpu.memory_space<vmem>>, vector<32x128xf32>
    %cst_52 = arith.constant dense<0.000000e+00> : vector<8x128xf32>
    %82 = tpu.matmul %80, %81, %cst_52 {dimension_numbers = #tpu.dot_dimension_numbers<[1], [0], [0], [1], [0, 0, 1, 1], [], []>} : vector<8x32xf32>, vector<32x128xf32>, vector<8x128xf32> -> vector<8x128xf32>
    %c40_53 = arith.constant 40 : index
    %c0_54 = arith.constant 0 : index
    %83 = vector.load %arg4[%c40_53, %c0_54] : memref<80x128xf32, #tpu.memory_space<vmem>>, vector<32x128xf32>
    %cst_55 = arith.constant dense<0.000000e+00> : vector<8x128xf32>
    %84 = tpu.matmul %77, %83, %cst_55 {dimension_numbers = #tpu.dot_dimension_numbers<[1], [0], [0], [1], [0, 0, 1, 1], [], []>} : vector<8x32xf32>, vector<32x128xf32>, vector<8x128xf32> -> vector<8x128xf32>
    %c760 = arith.constant 760 : index
    %c0_56 = arith.constant 0 : index
    %85 = vector.load %arg3[%c760, %c0_56] : memref<952x32xf32, #tpu.memory_space<vmem>>, vector<32x32xf32>
    %c792 = arith.constant 792 : index
    %c0_57 = arith.constant 0 : index
    %86 = vector.load %arg3[%c792, %c0_57] : memref<952x32xf32, #tpu.memory_space<vmem>>, vector<32x32xf32>
    %87 = vector.extract_strided_slice %84 {offsets = [0, 0], sizes = [8, 32], strides = [1, 1]} : vector<8x128xf32> to vector<8x32xf32>
    %88 = vector.extract_strided_slice %82 {offsets = [0, 0], sizes = [8, 32], strides = [1, 1]} : vector<8x128xf32> to vector<8x32xf32>
    %89 = arith.mulf %67, %88 : vector<8x32xf32>
    %cst_58 = arith.constant dense<0.000000e+00> : vector<8x32xf32>
    %90 = tpu.matmul %89, %85, %cst_58 {dimension_numbers = #tpu.dot_dimension_numbers<[1], [0], [0], [1], [0, 0, 1, 1], [], []>} : vector<8x32xf32>, vector<32x32xf32>, vector<8x32xf32> -> vector<8x32xf32>
    %91 = vector.extract_strided_slice %84 {offsets = [0, 32], sizes = [8, 32], strides = [1, 1]} : vector<8x128xf32> to vector<8x32xf32>
    %92 = vector.extract_strided_slice %82 {offsets = [0, 32], sizes = [8, 32], strides = [1, 1]} : vector<8x128xf32> to vector<8x32xf32>
    %93 = arith.mulf %67, %92 : vector<8x32xf32>
    %cst_59 = arith.constant dense<0.000000e+00> : vector<8x32xf32>
    %94 = tpu.matmul %93, %85, %cst_59 {dimension_numbers = #tpu.dot_dimension_numbers<[1], [0], [0], [1], [0, 0, 1, 1], [], []>} : vector<8x32xf32>, vector<32x32xf32>, vector<8x32xf32> -> vector<8x32xf32>
    %95 = vector.extract_strided_slice %84 {offsets = [0, 64], sizes = [8, 32], strides = [1, 1]} : vector<8x128xf32> to vector<8x32xf32>
    %96 = vector.extract_strided_slice %82 {offsets = [0, 64], sizes = [8, 32], strides = [1, 1]} : vector<8x128xf32> to vector<8x32xf32>
    %97 = arith.mulf %67, %96 : vector<8x32xf32>
    %cst_60 = arith.constant dense<0.000000e+00> : vector<8x32xf32>
    %98 = tpu.matmul %97, %85, %cst_60 {dimension_numbers = #tpu.dot_dimension_numbers<[1], [0], [0], [1], [0, 0, 1, 1], [], []>} : vector<8x32xf32>, vector<32x32xf32>, vector<8x32xf32> -> vector<8x32xf32>
    %99 = vector.extract_strided_slice %84 {offsets = [0, 96], sizes = [8, 32], strides = [1, 1]} : vector<8x128xf32> to vector<8x32xf32>
    %100 = vector.extract_strided_slice %82 {offsets = [0, 96], sizes = [8, 32], strides = [1, 1]} : vector<8x128xf32> to vector<8x32xf32>
    %101 = arith.mulf %67, %100 : vector<8x32xf32>
    %cst_61 = arith.constant dense<0.000000e+00> : vector<8x32xf32>
    %102 = tpu.matmul %101, %85, %cst_61 {dimension_numbers = #tpu.dot_dimension_numbers<[1], [0], [0], [1], [0, 0, 1, 1], [], []>} : vector<8x32xf32>, vector<32x32xf32>, vector<8x32xf32> -> vector<8x32xf32>
    %103 = arith.maximumf %90, %94 : vector<8x32xf32>
    %104 = arith.maximumf %103, %98 : vector<8x32xf32>
    %105 = arith.maximumf %104, %102 : vector<8x32xf32>
    %106 = arith.subf %90, %105 : vector<8x32xf32>
    %107 = math.exp %106 : vector<8x32xf32>
    %108 = arith.subf %94, %105 : vector<8x32xf32>
    %109 = math.exp %108 : vector<8x32xf32>
    %110 = arith.subf %98, %105 : vector<8x32xf32>
    %111 = math.exp %110 : vector<8x32xf32>
    %112 = arith.subf %102, %105 : vector<8x32xf32>
    %113 = math.exp %112 : vector<8x32xf32>
    %114 = arith.addf %107, %109 : vector<8x32xf32>
    %115 = arith.addf %114, %111 : vector<8x32xf32>
    %116 = arith.addf %115, %113 : vector<8x32xf32>
    %117 = tpu.reciprocal %116 {approx = true} : vector<8x32xf32> -> vector<8x32xf32>
    %cst_62 = arith.constant 0.000000e+00 : f32
    %118 = vector.broadcast %cst_62 : f32 to vector<8x32xf32>
    %119 = arith.mulf %107, %117 : vector<8x32xf32>
    %cst_63 = arith.constant dense<0.000000e+00> : vector<8x32xf32>
    %120 = tpu.matmul %119, %86, %cst_63 {dimension_numbers = #tpu.dot_dimension_numbers<[1], [0], [0], [1], [0, 0, 1, 1], [], []>} : vector<8x32xf32>, vector<32x32xf32>, vector<8x32xf32> -> vector<8x32xf32>
    %121 = arith.mulf %120, %87 : vector<8x32xf32>
    %122 = arith.addf %118, %121 : vector<8x32xf32>
    %123 = arith.mulf %109, %117 : vector<8x32xf32>
    %cst_64 = arith.constant dense<0.000000e+00> : vector<8x32xf32>
    %124 = tpu.matmul %123, %86, %cst_64 {dimension_numbers = #tpu.dot_dimension_numbers<[1], [0], [0], [1], [0, 0, 1, 1], [], []>} : vector<8x32xf32>, vector<32x32xf32>, vector<8x32xf32> -> vector<8x32xf32>
    %125 = arith.mulf %124, %91 : vector<8x32xf32>
    %126 = arith.addf %122, %125 : vector<8x32xf32>
    %127 = arith.mulf %111, %117 : vector<8x32xf32>
    %cst_65 = arith.constant dense<0.000000e+00> : vector<8x32xf32>
    %128 = tpu.matmul %127, %86, %cst_65 {dimension_numbers = #tpu.dot_dimension_numbers<[1], [0], [0], [1], [0, 0, 1, 1], [], []>} : vector<8x32xf32>, vector<32x32xf32>, vector<8x32xf32> -> vector<8x32xf32>
    %129 = arith.mulf %128, %95 : vector<8x32xf32>
    %130 = arith.addf %126, %129 : vector<8x32xf32>
    %131 = arith.mulf %113, %117 : vector<8x32xf32>
    %cst_66 = arith.constant dense<0.000000e+00> : vector<8x32xf32>
    %132 = tpu.matmul %131, %86, %cst_66 {dimension_numbers = #tpu.dot_dimension_numbers<[1], [0], [0], [1], [0, 0, 1, 1], [], []>} : vector<8x32xf32>, vector<32x32xf32>, vector<8x32xf32> -> vector<8x32xf32>
    %133 = arith.mulf %132, %99 : vector<8x32xf32>
    %134 = arith.addf %130, %133 : vector<8x32xf32>
    %c400 = arith.constant 400 : index
    %c0_67 = arith.constant 0 : index
    %135 = vector.load %arg3[%c400, %c0_67] : memref<952x32xf32, #tpu.memory_space<vmem>>, vector<32x32xf32>
    %cst_68 = arith.constant dense<0.000000e+00> : vector<8x32xf32>
    %136 = tpu.matmul %134, %135, %cst_68 {dimension_numbers = #tpu.dot_dimension_numbers<[1], [0], [0], [1], [0, 0, 1, 1], [], []>} : vector<8x32xf32>, vector<32x32xf32>, vector<8x32xf32> -> vector<8x32xf32>
    %c435 = arith.constant 435 : index
    %c0_69 = arith.constant 0 : index
    %137 = vector.load %arg3[%c435, %c0_69] : memref<952x32xf32, #tpu.memory_space<vmem>>, vector<1x32xf32>
    %138 = vector.broadcast %137 : vector<1x32xf32> to vector<8x32xf32>
    %139 = arith.addf %136, %138 : vector<8x32xf32>
    %140 = arith.addf %23, %139 : vector<8x32xf32>
    %cst_70 = arith.constant dense<0.000000e+00> : vector<8xf32>
    %141 = vector.multi_reduction <add>, %140, %cst_70 [1] : vector<8x32xf32> to vector<8xf32>
    %142 = vector.shape_cast %141 : vector<8xf32> to vector<8x1xf32>
    %cst_71 = arith.constant 3.200000e+01 : f32
    %143 = vector.broadcast %cst_71 : f32 to vector<8x1xf32>
    %144 = arith.divf %142, %143 : vector<8x1xf32>
    %145 = vector.broadcast %144 : vector<8x1xf32> to vector<8x32xf32>
    %146 = arith.subf %140, %145 : vector<8x32xf32>
    %147 = arith.mulf %146, %146 : vector<8x32xf32>
    %cst_72 = arith.constant dense<0.000000e+00> : vector<8xf32>
    %148 = vector.multi_reduction <add>, %147, %cst_72 [1] : vector<8x32xf32> to vector<8xf32>
    %149 = vector.shape_cast %148 : vector<8xf32> to vector<8x1xf32>
    %cst_73 = arith.constant 3.200000e+01 : f32
    %150 = vector.broadcast %cst_73 : f32 to vector<8x1xf32>
    %151 = arith.divf %149, %150 : vector<8x1xf32>
    %152 = vector.broadcast %144 : vector<8x1xf32> to vector<8x32xf32>
    %153 = arith.subf %140, %152 : vector<8x32xf32>
    %cst_74 = arith.constant 9.99999974E-6 : f32
    %154 = vector.broadcast %cst_74 : f32 to vector<8x1xf32>
    %155 = arith.addf %151, %154 : vector<8x1xf32>
    %156 = math.rsqrt %155 : vector<8x1xf32>
    %157 = vector.broadcast %156 : vector<8x1xf32> to vector<8x32xf32>
    %158 = arith.mulf %153, %157 : vector<8x32xf32>
    %c576 = arith.constant 576 : index
    %c0_75 = arith.constant 0 : index
    %159 = vector.load %arg3[%c576, %c0_75] : memref<952x32xf32, #tpu.memory_space<vmem>>, vector<1x32xf32>
    %160 = vector.broadcast %159 : vector<1x32xf32> to vector<8x32xf32>
    %161 = arith.mulf %158, %160 : vector<8x32xf32>
    %c584 = arith.constant 584 : index
    %c0_76 = arith.constant 0 : index
    %162 = vector.load %arg3[%c584, %c0_76] : memref<952x32xf32, #tpu.memory_space<vmem>>, vector<1x32xf32>
    %163 = vector.broadcast %162 : vector<1x32xf32> to vector<8x32xf32>
    %164 = arith.addf %161, %163 : vector<8x32xf32>
    %c0_77 = arith.constant 0 : index
    %c0_78 = arith.constant 0 : index
    %165 = vector.load %arg4[%c0_77, %c0_78] : memref<80x128xf32, #tpu.memory_space<vmem>>, vector<32x128xf32>
    %cst_79 = arith.constant dense<0.000000e+00> : vector<8x128xf32>
    %166 = tpu.matmul %164, %165, %cst_79 {dimension_numbers = #tpu.dot_dimension_numbers<[1], [0], [0], [1], [0, 0, 1, 1], [], []>} : vector<8x32xf32>, vector<32x128xf32>, vector<8x128xf32> -> vector<8x128xf32>
    %c32 = arith.constant 32 : index
    %c0_80 = arith.constant 0 : index
    %167 = vector.load %arg4[%c32, %c0_80] : memref<80x128xf32, #tpu.memory_space<vmem>>, vector<1x128xf32>
    %168 = vector.broadcast %167 : vector<1x128xf32> to vector<8x128xf32>
    %169 = arith.addf %166, %168 : vector<8x128xf32>
    %cst_81 = arith.constant 0.000000e+00 : f32
    %170 = vector.broadcast %cst_81 : f32 to vector<8x128xf32>
    %171 = arith.cmpf ogt, %169, %170 : vector<8x128xf32>
    %cst_82 = arith.constant 0.00999999977 : f32
    %172 = vector.broadcast %cst_82 : f32 to vector<8x128xf32>
    %173 = arith.mulf %172, %169 : vector<8x128xf32>
    %174 = arith.select %171, %169, %173 : vector<8x128xi1>, vector<8x128xf32>
    %c440 = arith.constant 440 : index
    %c0_83 = arith.constant 0 : index
    %175 = vector.load %arg3[%c440, %c0_83] : memref<952x32xf32, #tpu.memory_space<vmem>>, vector<128x32xf32>
    %cst_84 = arith.constant dense<0.000000e+00> : vector<8x32xf32>
    %176 = tpu.matmul %174, %175, %cst_84 {dimension_numbers = #tpu.dot_dimension_numbers<[1], [0], [0], [1], [0, 0, 1, 1], [], []>} : vector<8x128xf32>, vector<128x32xf32>, vector<8x32xf32> -> vector<8x32xf32>
    %c568 = arith.constant 568 : index
    %c0_85 = arith.constant 0 : index
    %177 = vector.load %arg3[%c568, %c0_85] : memref<952x32xf32, #tpu.memory_space<vmem>>, vector<1x32xf32>
    %178 = vector.broadcast %177 : vector<1x32xf32> to vector<8x32xf32>
    %179 = arith.addf %176, %178 : vector<8x32xf32>
    %180 = arith.addf %164, %179 : vector<8x32xf32>
    %cst_86 = arith.constant dense<0.000000e+00> : vector<8xf32>
    %181 = vector.multi_reduction <add>, %180, %cst_86 [1] : vector<8x32xf32> to vector<8xf32>
    %182 = vector.shape_cast %181 : vector<8xf32> to vector<8x1xf32>
    %cst_87 = arith.constant 3.200000e+01 : f32
    %183 = vector.broadcast %cst_87 : f32 to vector<8x1xf32>
    %184 = arith.divf %182, %183 : vector<8x1xf32>
    %185 = vector.broadcast %184 : vector<8x1xf32> to vector<8x32xf32>
    %186 = arith.subf %180, %185 : vector<8x32xf32>
    %187 = arith.mulf %186, %186 : vector<8x32xf32>
    %cst_88 = arith.constant dense<0.000000e+00> : vector<8xf32>
    %188 = vector.multi_reduction <add>, %187, %cst_88 [1] : vector<8x32xf32> to vector<8xf32>
    %189 = vector.shape_cast %188 : vector<8xf32> to vector<8x1xf32>
    %cst_89 = arith.constant 3.200000e+01 : f32
    %190 = vector.broadcast %cst_89 : f32 to vector<8x1xf32>
    %191 = arith.divf %189, %190 : vector<8x1xf32>
    %192 = vector.broadcast %184 : vector<8x1xf32> to vector<8x32xf32>
    %193 = arith.subf %180, %192 : vector<8x32xf32>
    %cst_90 = arith.constant 9.99999974E-6 : f32
    %194 = vector.broadcast %cst_90 : f32 to vector<8x1xf32>
    %195 = arith.addf %191, %194 : vector<8x1xf32>
    %196 = math.rsqrt %195 : vector<8x1xf32>
    %197 = vector.broadcast %196 : vector<8x1xf32> to vector<8x32xf32>
    %198 = arith.mulf %193, %197 : vector<8x32xf32>
    %c577 = arith.constant 577 : index
    %c0_91 = arith.constant 0 : index
    %199 = vector.load %arg3[%c577, %c0_91] : memref<952x32xf32, #tpu.memory_space<vmem>>, vector<1x32xf32>
    %200 = vector.broadcast %199 : vector<1x32xf32> to vector<8x32xf32>
    %201 = arith.mulf %198, %200 : vector<8x32xf32>
    %c585 = arith.constant 585 : index
    %c0_92 = arith.constant 0 : index
    %202 = vector.load %arg3[%c585, %c0_92] : memref<952x32xf32, #tpu.memory_space<vmem>>, vector<1x32xf32>
    %203 = vector.broadcast %202 : vector<1x32xf32> to vector<8x32xf32>
    %204 = arith.addf %201, %203 : vector<8x32xf32>
    %c0_93 = arith.constant 0 : index
    %c32_94 = arith.constant 32 : index
    %205 = vector.load %arg5[%c0_93, %c32_94] : memref<8x128xf32, #tpu.memory_space<vmem>>, vector<8x32xf32>
    tpu.vector_store %arg5[%c0_93, %c32_94], %204 {strides = array<i32>} : memref<8x128xf32, #tpu.memory_space<vmem>>, vector<8x32xf32>,
    %c592 = arith.constant 592 : index
    %c0_95 = arith.constant 0 : index
    %206 = vector.load %arg3[%c592, %c0_95] : memref<952x32xf32, #tpu.memory_space<vmem>>, vector<32x32xf32>
    %cst_96 = arith.constant dense<0.000000e+00> : vector<8x32xf32>
    %207 = tpu.matmul %204, %206, %cst_96 {dimension_numbers = #tpu.dot_dimension_numbers<[1], [0], [0], [1], [0, 0, 1, 1], [], []>} : vector<8x32xf32>, vector<32x32xf32>, vector<8x32xf32> -> vector<8x32xf32>
    %c624 = arith.constant 624 : index
    %c0_97 = arith.constant 0 : index
    %208 = vector.load %arg3[%c624, %c0_97] : memref<952x32xf32, #tpu.memory_space<vmem>>, vector<32x32xf32>
    %cst_98 = arith.constant dense<0.000000e+00> : vector<8x32xf32>
    %209 = tpu.matmul %204, %208, %cst_98 {dimension_numbers = #tpu.dot_dimension_numbers<[1], [0], [0], [1], [0, 0, 1, 1], [], []>} : vector<8x32xf32>, vector<32x32xf32>, vector<8x32xf32> -> vector<8x32xf32>
    %c824 = arith.constant 824 : index
    %c0_99 = arith.constant 0 : index
    %210 = vector.load %arg3[%c824, %c0_99] : memref<952x32xf32, #tpu.memory_space<vmem>>, vector<64x8xf32>
    %c888 = arith.constant 888 : index
    %c0_100 = arith.constant 0 : index
    %211 = vector.load %arg3[%c888, %c0_100] : memref<952x32xf32, #tpu.memory_space<vmem>>, vector<64x8xf32>
    %cst_101 = arith.constant dense<0.000000e+00> : vector<64x32xf32>
    %212 = tpu.matmul %210, %207, %cst_101 {dimension_numbers = #tpu.dot_dimension_numbers<[1], [0], [0], [1], [0, 0, 1, 1], [], []>} : vector<64x8xf32>, vector<8x32xf32>, vector<64x32xf32> -> vector<64x32xf32>
    %cst_102 = arith.constant dense<0.000000e+00> : vector<64x32xf32>
    %213 = tpu.matmul %211, %209, %cst_102 {dimension_numbers = #tpu.dot_dimension_numbers<[1], [0], [0], [1], [0, 0, 1, 1], [], []>} : vector<64x8xf32>, vector<8x32xf32>, vector<64x32xf32> -> vector<64x32xf32>
    %214 = arith.addf %212, %213 : vector<64x32xf32>
    %c656 = arith.constant 656 : index
    %c0_103 = arith.constant 0 : index
    %215 = vector.load %arg3[%c656, %c0_103] : memref<952x32xf32, #tpu.memory_space<vmem>>, vector<1x32xf32>
    %216 = vector.broadcast %215 : vector<1x32xf32> to vector<64x32xf32>
    %217 = arith.addf %214, %216 : vector<64x32xf32>
    %cst_104 = arith.constant 0.000000e+00 : f32
    %218 = vector.broadcast %cst_104 : f32 to vector<64x32xf32>
    %219 = arith.maximumf %217, %218 : vector<64x32xf32>
    %c664 = arith.constant 664 : index
    %c0_105 = arith.constant 0 : index
    %220 = vector.load %arg3[%c664, %c0_105] : memref<952x32xf32, #tpu.memory_space<vmem>>, vector<32x1xf32>
    %cst_106 = arith.constant dense<0.000000e+00> : vector<64x1xf32>
    %221 = tpu.matmul %219, %220, %cst_106 {dimension_numbers = #tpu.dot_dimension_numbers<[1], [0], [0], [1], [0, 0, 1, 1], [], []>} : vector<64x32xf32>, vector<32x1xf32>, vector<64x1xf32> -> vector<64x1xf32>
    %c72 = arith.constant 72 : index
    %c0_107 = arith.constant 0 : index
    %222 = vector.load %arg4[%c72, %c0_107] : memref<80x128xf32, #tpu.memory_space<vmem>>, vector<8x64xf32>
    %c696 = arith.constant 696 : index
    %c0_108 = arith.constant 0 : index
    %223 = vector.load %arg3[%c696, %c0_108] : memref<952x32xf32, #tpu.memory_space<vmem>>, vector<1x1xf32>
    %224 = vector.broadcast %221 : vector<64x1xf32> to vector<64x8xf32>
    %225 = arith.mulf %224, %211 : vector<64x8xf32>
    %cst_109 = arith.constant dense<0.000000e+00> : vector<8x8xf32>
    %226 = tpu.matmul %222, %225, %cst_109 {dimension_numbers = #tpu.dot_dimension_numbers<[1], [0], [0], [1], [0, 0, 1, 1], [], []>} : vector<8x64xf32>, vector<64x8xf32>, vector<8x8xf32> -> vector<8x8xf32>
    %227 = vector.broadcast %223 : vector<1x1xf32> to vector<8x8xf32>
    %228 = arith.addf %226, %227 : vector<8x8xf32>
    %229 = arith.negf %228 : vector<8x8xf32>
    %230 = math.exp %229 : vector<8x8xf32>
    %cst_110 = arith.constant 1.000000e+00 : f32
    %231 = vector.broadcast %cst_110 : f32 to vector<8x8xf32>
    %232 = arith.addf %231, %230 : vector<8x8xf32>
    %233 = arith.divf %231, %232 : vector<8x8xf32>
    %c0_111 = arith.constant 0 : index
    %c64 = arith.constant 64 : index
    %234 = vector.load %arg5[%c0_111, %c64] : memref<8x128xf32, #tpu.memory_space<vmem>>, vector<8x8xf32>
    tpu.vector_store %arg5[%c0_111, %c64], %233 {strides = array<i32>} : memref<8x128xf32, #tpu.memory_space<vmem>>, vector<8x8xf32>,
    %235 = arith.mulf %204, %204 : vector<8x32xf32>
    %cst_112 = arith.constant dense<0.000000e+00> : vector<8xf32>
    %236 = vector.multi_reduction <add>, %235, %cst_112 [1] : vector<8x32xf32> to vector<8xf32>
    %237 = vector.shape_cast %236 : vector<8xf32> to vector<8x1xf32>
    %238 = math.sqrt %237 : vector<8x1xf32>
    %cst_113 = arith.constant 9.99999993E-9 : f32
    %239 = vector.broadcast %cst_113 : f32 to vector<8x1xf32>
    %240 = arith.maximumf %238, %239 : vector<8x1xf32>
    %241 = tpu.reciprocal %240 {approx = true} : vector<8x1xf32> -> vector<8x1xf32>
    %242 = vector.broadcast %241 : vector<8x1xf32> to vector<8x32xf32>
    %243 = arith.mulf %204, %242 : vector<8x32xf32>
    %cst_114 = arith.constant dense<0.000000e+00> : vector<8x8xf32>
    %244 = tpu.matmul %243, %243, %cst_114 {dimension_numbers = #tpu.dot_dimension_numbers<[1], [1], [0], [0], [0, 0, 1, 0], [], []>} : vector<8x32xf32>, vector<8x32xf32>, vector<8x8xf32> -> vector<8x8xf32>
    %cst_115 = arith.constant dense<0.000000e+00> : vector<8xf32>
    %245 = vector.multi_reduction <add>, %244, %cst_115 [1] : vector<8x8xf32> to vector<8xf32>
    %246 = vector.shape_cast %245 : vector<8xf32> to vector<8x1xf32>
    %cst_116 = arith.constant dense<0.000000e+00> : vector<1xf32>
    %247 = vector.multi_reduction <add>, %246, %cst_116 [0] : vector<8x1xf32> to vector<1xf32>
    %248 = vector.shape_cast %247 : vector<1xf32> to vector<1x1xf32>
    %cst_117 = arith.constant 8.000000e+00 : f32
    %249 = vector.broadcast %cst_117 : f32 to vector<1x1xf32>
    %250 = arith.subf %248, %249 : vector<1x1xf32>
    %cst_118 = arith.constant 5.600000e+01 : f32
    %251 = vector.broadcast %cst_118 : f32 to vector<1x1xf32>
    %252 = arith.divf %250, %251 : vector<1x1xf32>
    %cst_119 = arith.constant 1.000000e+00 : f32
    %253 = vector.broadcast %cst_119 : f32 to vector<1x1xf32>
    %254 = arith.subf %253, %252 : vector<1x1xf32>
    %c704 = arith.constant 704 : index
    %c0_120 = arith.constant 0 : index
    %255 = vector.load %arg3[%c704, %c0_120] : memref<952x32xf32, #tpu.memory_space<vmem>>, vector<32x32xf32>
    %cst_121 = arith.constant dense<0.000000e+00> : vector<8x32xf32>
    %256 = tpu.matmul %204, %255, %cst_121 {dimension_numbers = #tpu.dot_dimension_numbers<[1], [0], [0], [1], [0, 0, 1, 1], [], []>} : vector<8x32xf32>, vector<32x32xf32>, vector<8x32xf32> -> vector<8x32xf32>
    %c736 = arith.constant 736 : index
    %c0_122 = arith.constant 0 : index
    %257 = vector.load %arg3[%c736, %c0_122] : memref<952x32xf32, #tpu.memory_space<vmem>>, vector<1x32xf32>
    %258 = vector.broadcast %257 : vector<1x32xf32> to vector<8x32xf32>
    %259 = arith.addf %256, %258 : vector<8x32xf32>
    %260 = arith.negf %259 : vector<8x32xf32>
    %261 = math.exp %260 : vector<8x32xf32>
    %cst_123 = arith.constant 1.000000e+00 : f32
    %262 = vector.broadcast %cst_123 : f32 to vector<8x32xf32>
    %263 = arith.addf %262, %261 : vector<8x32xf32>
    %264 = arith.divf %262, %263 : vector<8x32xf32>
    %cst_124 = arith.constant 5.000000e-01 : f32
    %265 = vector.broadcast %cst_124 : f32 to vector<8x32xf32>
    %266 = arith.cmpf ogt, %264, %265 : vector<8x32xf32>
    %267 = arith.extui %266 : vector<8x32xi1> to vector<8x32xi32>
    %268 = arith.sitofp %267 : vector<8x32xi32> to vector<8x32xf32>
    %cst_125 = arith.constant dense<0.000000e+00> : vector<32xf32>
    %269 = vector.multi_reduction <add>, %268, %cst_125 [0] : vector<8x32xf32> to vector<32xf32>
    %270 = vector.shape_cast %269 : vector<32xf32> to vector<1x32xf32>
    %cst_126 = arith.constant 0.000000e+00 : f32
    %271 = vector.broadcast %cst_126 : f32 to vector<1x32xf32>
    %272 = arith.cmpf ogt, %270, %271 : vector<1x32xf32>
    %273 = arith.extui %272 : vector<1x32xi1> to vector<1x32xi32>
    %274 = arith.sitofp %273 : vector<1x32xi32> to vector<1x32xf32>
    %cst_127 = arith.constant dense<0.000000e+00> : vector<1xf32>
    %275 = vector.multi_reduction <add>, %274, %cst_127 [1] : vector<1x32xf32> to vector<1xf32>
    %276 = vector.shape_cast %275 : vector<1xf32> to vector<1x1xf32>
    %cst_128 = arith.constant 8.000000e+00 : f32
    %277 = vector.broadcast %cst_128 : f32 to vector<1x1xf32>
    %278 = arith.divf %276, %277 : vector<1x1xf32>
    %279 = tpu.iota {dimensions = array<i32: 1>} : vector<1x8xi32>
    %c0_i32 = arith.constant 0 : i32
    %280 = vector.broadcast %c0_i32 : i32 to vector<1x8xi32>
    %281 = arith.cmpi eq, %279, %280 : vector<1x8xi32>
    %c1_i32 = arith.constant 1 : i32
    %282 = vector.broadcast %c1_i32 : i32 to vector<1x8xi32>
    %283 = arith.cmpi eq, %279, %282 : vector<1x8xi32>
    %cst_129 = arith.constant 0.000000e+00 : f32
    %284 = vector.shape_cast %278 : vector<1x1xf32> to vector<1x1xf32>
    %285 = vector.broadcast %284 : vector<1x1xf32> to vector<1x8xf32>
    %286 = vector.broadcast %cst_129 : f32 to vector<1x8xf32>
    %287 = arith.select %283, %285, %286 : vector<1x8xi1>, vector<1x8xf32>
    %288 = vector.shape_cast %254 : vector<1x1xf32> to vector<1x1xf32>
    %289 = vector.broadcast %288 : vector<1x1xf32> to vector<1x8xf32>
    %290 = arith.select %281, %289, %287 : vector<1x8xi1>, vector<1x8xf32>
    %c0_130 = arith.constant 0 : index
    %c72_131 = arith.constant 72 : index
    %291 = vector.load %arg5[%c0_130, %c72_131] : memref<8x128xf32, #tpu.memory_space<vmem>>, vector<1x8xf32>
    tpu.vector_store %arg5[%c0_130, %c72_131], %290 {strides = array<i32>} : memref<8x128xf32, #tpu.memory_space<vmem>>, vector<1x8xf32>,
    return
  }
}

</mosaic_0001>

<bundles_post_ra>
// kernel: ceda_forward.1
= control target key start
LH: loop header
LB: loop body
LE: loop exit
PB: predicated region body
PF: predicated region fallthrough
CT: control target
= control target key end

     0   :  { %v4069_v0 = vmov 0   ;;  %v4070_v2 = vmov 0.0|0.0   ;;  %vm4071_vm0 = vmmov 0   ;;  %v4072_v8 = vmov 0.0   ;;  %s4073_s24 = smov 64   ;;  %s4074_s25 = smov 96   ;;  %s4807_s0 = inlined_call_operand.vmem [shape: s32[8,1], index: 0, kind: input, shape index: {}]   ;;  %s4808_s3 = inlined_call_operand.vmem [shape: f32[952,32], index: 3, kind: input, shape index: {}]   ;;  %s4809_s1 = inlined_call_operand.vmem [shape: f32[8,16], index: 1, kind: input, shape index: {}]   ;;  %s4810_s5 = inlined_call_operand.vmem [shape: f32[8,128], index: 5, kind: output, shape index: {}]   ;;  %s4811_s2 = inlined_call_operand.vmem [shape: f32[8,32], index: 2, kind: input, shape index: {}]   ;;  %s4812_s4 = inlined_call_operand.vmem [shape: f32[80,128], index: 4, kind: input, shape index: {}]  }
   0x1   :  { %4041 = vset.pattern.permute.xlu0 %v4069_v0  ;;  %v23_v1 = vld [vmem:[%s4807_s0] sm:$0xff]  ;;  %3820 = vmatprep.subr.bf16.mxu1 %v4070_v2  ;;  %v108_v4 = vld [vmem:[%s4808_s3 + $0x8] sm:$0xff]  ;;  %v31_v7 = vld [vmem:[%s4808_s3 + $0x2f0] sm:$0xff]  ;;  %vm32_vm1 = vcmask 130048   ;;  %v21_v17 = vlaneseq  ;;  %vm195_vm3 = vcmask 261120   ;;  %20 = vst [vmem:[%s4810_s5] sm:$0xff] %v4072_v8  ;;  %vm2365_vm5 = vcmask 64512  }
   0x2   :  { %v107_v3 = vld [vmem:[%s4808_s3] sm:$0xff]  ;;  %25 = vperm.xlu0 %4041, %v23_v1   ;;  %3817 = vmatprep.subr.bf16.mxu0 %v4070_v2  ;;  %v30_v6 = vld [vmem:[%s4808_s3 + $0x2e8] sm:$0xff]  ;;  %v187_v11 = vld [vmem:[%s4808_s3 + $0x18] sm:$0xff]  ;;  %vm2832_vm6 = vcmask 523264   ;;  %vm2197_vm7 = vcmask 523520   ;;  %vm2916_vm12 = vcmask 589312  }
   0x3   :  { %v3821_v5 = vpack.c.bf16 %v108_v4, %v107_v3  ;;  %3421 = vmatprep.mubr.msk.f32.mxu1 %vm4071_vm0, %v4072_v8  ;;  %v3818_v9 = vpack.c.bf16 %v31_v7, %v30_v6  ;;  %3414 = vmatprep.mubr.msk.f32.mxu0 %vm4071_vm0, %v4072_v8  ;;  %v106_v10 = vld [vmem:[%s4809_s1] sm:$0xff]  ;;  %v189_v14 = vld [vmem:[%s4808_s3 + $0x28] sm:$0xff]  ;;  %v190_v15 = vld [vmem:[%s4808_s3 + $0x30] sm:$0xff]  ;;  %v4150_v18 = vand.u32 127, %v21_v17  ;;  %vm3129_vm15 = vcmask 647744  }
   0x4   :  { %v188_v12 = vld [vmem:[%s4808_s3 + $0x20] sm:$0xff]  ;;  %4042 = vset.pattern.permute.xlu1 %v4069_v0  ;;  %v3833_v16 = vpack.c.bf16 %v190_v15, %v189_v14  ;;  %v191_v19 = vld [vmem:[%s4808_s3 + $0x38] sm:$0xff]  ;;  %v193_v23 = vld [vmem:[%s4808_s3 + $0x48] sm:$0xff] }
   0x5   :  { %3822 = vmatpush3.bf16.msra.mxu1 %v3821_v5  ;;  %3819 = vmatpush3.bf16.msra.mxu0 %v3818_v9  ;;  %v3830_v13 = vpack.c.bf16 %v188_v12, %v187_v11  ;;  %v192_v20 = vld [vmem:[%s4808_s3 + $0x40] sm:$0xff]  ;;  %v194_v24 = vld [vmem:[%s4808_s3 + $0x50] sm:$0xff]  ;;  %v350_v32 = vld [vmem:[%s4808_s3 + $0x68] sm:$0xff]  ;;  %vm3122_vm13 = vcmp.eq.s32.totalorder %v4150_v18, 1  ;;  %vm3121_vm14 = vcmp.eq.s32.totalorder %v4150_v18, 0 }
   0x6   :  { %3829 = vmatprep.subr.bf16.mxu1 %v4070_v2  ;;  %3823 = vmatprep.subr.bf16.mxu0 %v4070_v2  ;;  %v3824_v22 = vpack.c.bf16 %v192_v20, %v191_v19  ;;  %v3827_v26 = vpack.c.bf16 %v194_v24, %v193_v23  ;;  %v3137_v27 = vld [vmem:[%s4808_s3 + $0x10] ss:$0 sm:$0xff]  ;;  %v349_v31 = vld [vmem:[%s4808_s3 + $0x60] sm:$0xff]  ;;  %v352_v37 = vld [vmem:[%s4808_s3 + $0x78] sm:$0xff] }
   0x7   :  { %v3836_v33 = vpack.c.bf16 %v350_v32, %v349_v31  ;;  %v351_v36 = vld [vmem:[%s4808_s3 + $0x70] sm:$0xff]  ;;  %v432_v41 = vld [vmem:[%s4808_s3 + $0xc8] sm:$0xff]  ;;  %v515_v44 = vld [vmem:[%s4808_s3 + $0x80] sm:$0xff] }
   0x8   :  { %3422 = vmatmul.mubr.msk.f32.vlgmr.msra.gmra.mrb[0].mxu1 %vm32_vm1, %v106_v10  ;;  %v3839_v38 = vpack.c.bf16 %v352_v37, %v351_v36  ;;  %v433_v42 = vld [vmem:[%s4808_s3 + $0xd0] sm:$0xff]  ;;  %v516_v45 = vld [vmem:[%s4808_s3 + $0x88] sm:$0xff]  ;;  %v3141_v47 = vld [vmem:[%s4808_s3 + $0x58] ss:$0 sm:$0xff] }
   0x9   :  { %3831 = vmatpush3.bf16.msra.mxu1 %v3830_v13  ;;  %3443 = vmatprep.mubr.msk.f32.mxu1 %vm4071_vm0, %v4072_v8  ;;  %v3842_v43 = vpack.c.bf16 %v433_v42, %v432_v41  ;;  %v3848_v50 = vpack.c.bf16 %v516_v45, %v515_v44  ;;  %v517_v52 = vld [vmem:[%s4808_s3 + $0x90] sm:$0xff]  ;;  %v518_v53 = vld [vmem:[%s4808_s3 + $0x98] sm:$0xff]  ;;  %v514_v55 = vld [vmem:[%s4811_s2] sm:$0xff]  ;;  %s4075_s2 = smov 32  }
   0xa   :  { %3832 = vmatprep.subr.bf16.mxu1 %v4070_v2  ;;  %v3851_v54 = vpack.c.bf16 %v518_v53, %v517_v52  ;;  %v434_v56 = vld [vmem:[%s4808_s3 + $0xd8] sm:$0xff]  ;;  %v435_v57 = vld [vmem:[%s4808_s3 + $0xe0] sm:$0xff]  ;;  %v598_v60 = vld [vmem:[%s4808_s3 + $0xe8] sm:$0xff] }
   0xb   :  { %v3845_v58 = vpack.c.bf16 %v435_v57, %v434_v56  ;;  %v3142_v59 = vld [vmem:[%s4808_s3 + $0xc0] ss:$0 sm:$0xff]  ;;  %v599_v61 = vld [vmem:[%s4808_s3 + $0xf0] sm:$0xff]  ;;  %v600_v4 = vld [vmem:[%s4808_s3 + $0xf8] sm:$0xff] }
   0xc   :  { %v3854_v1 = vpack.c.bf16 %v599_v61, %v598_v60  ;;  %v601_v5 = vld [vmem:[%s4808_s3 + $0x100] sm:$0xff]  ;;  %v682_v14 = vld [vmem:[%s4808_s3 + $0xa8] sm:$0xff]  ;;  %v684_v17 = vld [vmem:[%s4808_s3 + $0xb8] sm:$0xff] }
   0xd   :  { %3834 = vmatpush3.bf16.msra.mxu1 %v3833_v16  ;;  %v3146_v6 = vld [vmem:[%s4808_s3 + $0xc1] ss:$0 sm:$0xff]  ;;  %v3857_v7 = vpack.c.bf16 %v601_v5, %v600_v4  ;;  %v683_v16 = vld [vmem:[%s4808_s3 + $0xb0] sm:$0xff]  ;;  %v764_v20 = vld [vmem:[%s4808_s3 + $0x108] sm:$0xff] }
   0xe   :  { %3841 = vmatprep.subr.bf16.mxu1 %v4070_v2  ;;  %v681_v13 = vld [vmem:[%s4808_s3 + $0xa0] sm:$0xff]  ;;  %v3863_v19 = vpack.c.bf16 %v684_v17, %v683_v16  ;;  %v849_v36 = vld [vmem:[%s4808_s3 + $0x148] sm:$0xff]  ;;  %v766_v44 = vld [vmem:[%s4808_s3 + $0x118] sm:$0xff] }
   0xf   :  { %v3860_v15 = vpack.c.bf16 %v682_v14, %v681_v13  ;;  %v1006_v41 = vld [vmem:[%s4808_s3 + $0x180] sm:$0xff]  ;;  %v1007_v42 = vld [vmem:[%s4808_s3 + $0x188] sm:$0xff]  ;;  %v926_v56 = vld [vmem:[%s4808_s3 + $0x158] sm:$0xff] }
  0x10   :  { %v767_v45 = vld [vmem:[%s4808_s3 + $0x120] sm:$0xff]  ;;  %v3158_v4 = vld [vmem:[%s4808_s3 + $0x1b2] ss:$0 sm:$0xff]  ;;  %v3156_v14 = vld [vmem:[%s4808_s3 + $0x1b1] ss:$0 sm:$0xff] }
  0x11   :  { %v1088_v52 = vld [vmem:[%s4812_s4 + $0x40] sm:$0xff] }
  0x81   :  { %v26_v21 = vpop.permute.xlu0 %25 }
  0x82   :  { %vm27_vm2 = vcmp.eq.s32.totalorder %v4150_v18, %v26_v21  ;;  %v765_v21 = vld [vmem:[%s4808_s3 + $0x110] sm:$0xff] }
  0x83   :  { %v3135_v25 = vsel %vm27_vm2, 1.0, %v4072_v8 }
  0x84   :  { %3415 = vmatmul.mubr.msk.f32.vlgmr.msra.gmra.mrb[0].mxu0 %vm32_vm1, %v3135_v25  ;;  %v3144_v25 = vld [vmem:[%s4808_s3 + $0x128] ss:$0 sm:$0xff] }
  0x85   :  { %3825 = vmatpush3.bf16.msra.mxu0 %v3824_v22  ;;  %3432 = vmatprep.mubr.msk.f32.mxu0 %vm4071_vm0, %v4072_v8  ;;  %v3866_v22 = vpack.c.bf16 %v765_v21, %v764_v20 }
  0x86   :  { %3826 = vmatprep.subr.bf16.mxu0 %v4070_v2 }
  0x89   :  { %3828 = vmatpush3.bf16.msra.mxu0 %v3827_v26  ;;  %v3148_v26 = vld [vmem:[%s4808_s3 + $0x129] ss:$0 sm:$0xff] }
  0x8a   :  { %3835 = vmatprep.subr.bf16.mxu0 %v4070_v2 }
  0xdb   :  { %v183_v28 = vpop.f32.mrb[0].mxu1 }
  0xdc   :  { %v184_v29 = vadd.f32 %v3137_v27, %v183_v28  ;;  %v3423_v30 = vpop.f32.mrb[1].mxu1  ;;  %v846_v27 = vld [vmem:[%s4808_s3 + $0x130] sm:$0xff]  ;;  %v847_v28 = vld [vmem:[%s4808_s3 + $0x138] sm:$0xff] }
  0xde   :  { %3444 = vmatmul.mubr.msk.f32.vlgmr.msra.gmra.mrb[2].mxu1 %vm195_vm3, %v184_v29 }
  0xdf   :  { %3465 = vmatprep.mubr.msk.f32.mxu1 %vm4071_vm0, %v4072_v8  ;;  %3843 = vmatpush3.bf16.msra.mxu1 %v3842_v43  ;;  %v3887_v43 = vpack.c.bf16 %v1007_v42, %v1006_v41  ;;  %v1239_v41 = vld [vmem:[%s4808_s3 + $0x318] sm:$0xff]  ;;  %v1240_v42 = vld [vmem:[%s4808_s3 + $0x320] sm:$0xff] }
  0xe0   :  { %3844 = vmatprep.subr.bf16.mxu1 %v4070_v2 }
  0xe3   :  { %3846 = vmatpush3.bf16.msra.mxu1 %v3845_v58 }
  0xe4   :  { %3853 = vmatprep.subr.bf16.mxu1 %v4070_v2 }
 0x157   :  { %v102_v34 = vpop.f32.mrb[0].mxu0 }
 0x158   :  { %v3416_v35 = vpop.f32.mrb[1].mxu0  ;;  %3433 = vmatmul.mubr.msk.f32.vlgmr.msra.gmra.mrb[2].mxu0 %vm195_vm3, %v102_v34 }
 0x159   :  { %3837 = vmatpush3.bf16.msra.mxu0 %v3836_v33  ;;  %3454 = vmatprep.mubr.msk.f32.mxu0 %vm4071_vm0, %v4072_v8  ;;  %v3872_v33 = vpack.c.bf16 %v847_v28, %v846_v27  ;;  %v848_v35 = vld [vmem:[%s4808_s3 + $0x140] sm:$0xff]  ;;  %v3154_v28 = vld [vmem:[%s4808_s3 + $0x1b0] ss:$0 sm:$0xff] }
 0x15a   :  { %3838 = vmatprep.subr.bf16.mxu0 %v4070_v2  ;;  %v3875_v37 = vpack.c.bf16 %v849_v36, %v848_v35 }
 0x15d   :  { %3840 = vmatpush3.bf16.msra.mxu0 %v3839_v38  ;;  %v1004_v38 = vld [vmem:[%s4808_s3 + $0x170] sm:$0xff] }
 0x15e   :  { %3847 = vmatprep.subr.bf16.mxu0 %v4070_v2 }
 0x1b1   :  { %v338_v39 = vpop.f32.mrb[2].mxu1 }
 0x1b2   :  { %v3445_v40 = vpop.f32.mrb[3].mxu1 }
 0x22b   :  { %v265_v46 = vpop.f32.mrb[2].mxu0 }
 0x22c   :  { %v339_v48 = vadd.f32 %v338_v39, %v265_v46  ;;  %v3434_v49 = vpop.f32.mrb[3].mxu0  ;;  %v1005_v39 = vld [vmem:[%s4808_s3 + $0x178] sm:$0xff]  ;;  %v3869_v46 = vpack.c.bf16 %v767_v45, %v766_v44  ;;  %v3926_v44 = vpack.c.bf16 %v1240_v42, %v1239_v41  ;;  %v1242_v45 = vld [vmem:[%s4808_s3 + $0x330] sm:$0xff] }
 0x22d   :  { %v3884_v40 = vpack.c.bf16 %v1005_v39, %v1004_v38 }
 0x22e   :  { %v4214_v51 = vadd.f32 %v3141_v47, %v339_v48  ;;  %v1085_v47 = vld [vmem:[%s4812_s4 + $0x28] sm:$0xff]  ;;  %v1086_v48 = vld [vmem:[%s4812_s4 + $0x30] sm:$0xff] }
 0x22f   :  { %v3890_v49 = vpack.c.bf16 %v1086_v48, %v1085_v47 }
 0x230   :  { %3455 = vmatmul.mubr.msk.f32.vlgmr.msra.gmra.mrb[4].mxu0 %vm195_vm3, %v4214_v51  ;;  %348 = vst.msk [vmem:[%s4810_s5] sm:$0xff] %vm195_vm3, %v4214_v51 }
 0x231   :  { %3849 = vmatpush3.bf16.msra.mxu0 %v3848_v50  ;;  %3476 = vmatprep.mubr.msk.f32.mxu0 %vm4071_vm0, %v4072_v8  ;;  %v1087_v50 = vld [vmem:[%s4812_s4 + $0x38] sm:$0xff] }
 0x232   :  { %3850 = vmatprep.subr.bf16.mxu0 %v4070_v2  ;;  %v3893_v53 = vpack.c.bf16 %v1088_v52, %v1087_v50 }
 0x235   :  { %3852 = vmatpush3.bf16.msra.mxu0 %v3851_v54  ;;  %v3150_v54 = vld [vmem:[%s4808_s3 + $0xc2] ss:$0 sm:$0xff] }
 0x236   :  { %3859 = vmatprep.subr.bf16.mxu0 %v4070_v2 }
 0x238   :  { %3477 = vmatmul.mubr.msk.f32.vlgmr.msra.gmra.mrb[6].mxu0 %vm195_vm3, %v514_v55  ;;  %v925_v55 = vld [vmem:[%s4808_s3 + $0x150] sm:$0xff] }
 0x239   :  { %3498 = vmatprep.mubr.msk.f32.mxu0 %vm4071_vm0, %v4072_v8  ;;  %3861 = vmatpush3.bf16.msra.mxu0 %v3860_v15  ;;  %v3878_v60 = vpack.c.bf16 %v926_v56, %v925_v55  ;;  %v3152_v15 = vld [vmem:[%s4808_s3 + $0x12a] ss:$0 sm:$0xff] }
 0x23a   :  { %3862 = vmatprep.subr.bf16.mxu0 %v4070_v2 }
 0x23d   :  { %3864 = vmatpush3.bf16.msra.mxu0 %v3863_v19 }
 0x23e   :  { %3871 = vmatprep.subr.bf16.mxu0 %v4070_v2 }
 0x303   :  { %v427_v62 = vpop.f32.mrb[4].mxu0 }
 0x304   :  { %v428_v63 = vadd.f32 %v3142_v59, %v427_v62  ;;  %v3456_v0 = vpop.f32.mrb[5].mxu0  ;;  %v927_v62 = vld [vmem:[%s4808_s3 + $0x160] sm:$0xff] }
 0x306   :  { %v431_v3 = vmax.f32 %v428_v63, 0.0  ;;  %v928_v63 = vld [vmem:[%s4808_s3 + $0x168] sm:$0xff] }
 0x307   :  { %v3881_v0 = vpack.c.bf16 %v928_v63, %v927_v62 }
 0x308   :  { %3466 = vmatmul.mubr.msk.f32.vlgmr.msra.gmra.mrb[4].mxu1 %vm195_vm3, %v431_v3 }
 0x309   :  { %3855 = vmatpush3.bf16.msra.mxu1 %v3854_v1  ;;  %3487 = vmatprep.mubr.msk.f32.mxu1 %vm4071_vm0, %v4072_v8 }
 0x30a   :  { %3856 = vmatprep.subr.bf16.mxu1 %v4070_v2 }
 0x30b   :  { %v593_v9 = vpop.f32.mrb[6].mxu0 }
 0x30c   :  { %v594_v10 = vadd.f32 %v3146_v6, %v593_v9  ;;  %v3478_v11 = vpop.f32.mrb[7].mxu0  ;;  %v1235_v9 = vld [vmem:[%s4808_s3 + $0x2f8] sm:$0xff] }
 0x30d   :  { %3858 = vmatpush3.bf16.msra.mxu1 %v3857_v7 }
 0x30e   :  { %v597_v12 = vmax.f32 %v594_v10, 0.0  ;;  %3865 = vmatprep.subr.bf16.mxu1 %v4070_v2  ;;  %v1236_v10 = vld [vmem:[%s4808_s3 + $0x300] sm:$0xff] }
 0x30f   :  { %v3902_v11 = vpack.c.bf16 %v1236_v10, %v1235_v9 }
 0x310   :  { %3488 = vmatmul.mubr.msk.f32.vlgmr.msra.gmra.mrb[6].mxu1 %vm195_vm3, %v597_v12 }
 0x311   :  { %3509 = vmatprep.mubr.msk.f32.mxu1 %vm4071_vm0, %v4072_v8  ;;  %3867 = vmatpush3.bf16.msra.mxu1 %v3866_v22 }
 0x312   :  { %3868 = vmatprep.subr.bf16.mxu1 %v4070_v2 }
 0x315   :  { %3870 = vmatpush3.bf16.msra.mxu1 %v3869_v46 }
 0x316   :  { %3877 = vmatprep.subr.bf16.mxu1 %v4070_v2 }
 0x3db   :  { %v510_v23 = vpop.f32.mrb[4].mxu1 }
 0x3dc   :  { %v3467_v24 = vpop.f32.mrb[5].mxu1  ;;  %v511_v30 = vadd.f32 %v3144_v25, %v510_v23  ;;  %v1237_v25 = vld [vmem:[%s4808_s3 + $0x308] sm:$0xff] }
 0x3e3   :  { %v676_v29 = vpop.f32.mrb[6].mxu1 }
 0x3e4   :  { %v677_v31 = vadd.f32 %v3148_v26, %v676_v29  ;;  %v3489_v32 = vpop.f32.mrb[7].mxu1  ;;  %v1238_v26 = vld [vmem:[%s4808_s3 + $0x310] sm:$0xff] }
 0x3e5   :  { %v3905_v27 = vpack.c.bf16 %v1238_v26, %v1237_v25 }
 0x3e6   :  { %v680_v34 = vsub.f32 %v511_v30, %v677_v31 }
 0x3e8   :  { %3499 = vmatmul.mubr.msk.f32.vlgmr.msra.gmra.mrb[8].mxu0 %vm195_vm3, %v680_v34 }
 0x3e9   :  { %3873 = vmatpush3.bf16.msra.mxu0 %v3872_v33  ;;  %3520 = vmatprep.mubr.msk.f32.mxu0 %vm4071_vm0, %v4072_v8 }
 0x3ea   :  { %3874 = vmatprep.subr.bf16.mxu0 %v4070_v2 }
 0x3ed   :  { %3876 = vmatpush3.bf16.msra.mxu0 %v3875_v37 }
 0x3ee   :  { %3883 = vmatprep.subr.bf16.mxu0 %v4070_v2 }
 0x3f0   :  { %3521 = vmatmul.mubr.msk.f32.vlgmr.msra.gmra.mrb[10].mxu0 %vm195_vm3, %v4214_v51 }
 0x3f1   :  { %3885 = vmatpush3.bf16.msra.mxu0 %v3884_v40  ;;  %3542 = vmatprep.mubr.msk.f32.mxu0 %vm4071_vm0, %v4072_v8 }
 0x3f2   :  { %3886 = vmatprep.subr.bf16.mxu0 %v4070_v2 }
 0x3f5   :  { %3888 = vmatpush3.bf16.msra.mxu0 %v3887_v43  ;;  %v1241_v43 = vld [vmem:[%s4808_s3 + $0x328] sm:$0xff] }
 0x3f6   :  { %3895 = vmatprep.subr.bf16.mxu0 %v4070_v2  ;;  %v3929_v46 = vpack.c.bf16 %v1242_v45, %v1241_v43 }
 0x3f8   :  { %3543 = vmatmul.mubr.msk.f32.vlgmr.msra.gmra.mrb[12].mxu0 %vm195_vm3, %v4214_v51 }
 0x3f9   :  { %3564 = vmatprep.mubr.msk.f32.mxu0 %vm4071_vm0, %v4072_v8  ;;  %3897 = vmatpush3.bf16.msra.mxu0 %v3890_v49 }
 0x3fa   :  { %3898 = vmatprep.subr.bf16.mxu0 %v4070_v2 }
 0x3fd   :  { %3900 = vmatpush3.bf16.msra.mxu0 %v3893_v53 }
 0x3fe   :  { %3907 = vmatprep.subr.bf16.mxu0 %v4070_v2 }
 0x4bb   :  { %v759_v57 = vpop.f32.mrb[8].mxu0 }
 0x4bc   :  { %v760_v58 = vadd.f32 %v3150_v54, %v759_v57  ;;  %v3500_v59 = vpop.f32.mrb[9].mxu0 }
 0x4be   :  { %v763_v61 = vmax.f32 %v760_v58, 0.0 }
 0x4c0   :  { %3510 = vmatmul.mubr.msk.f32.vlgmr.msra.gmra.mrb[8].mxu1 %vm195_vm3, %v763_v61 }
 0x4c1   :  { %3879 = vmatpush3.bf16.msra.mxu1 %v3878_v60  ;;  %3531 = vmatprep.mubr.msk.f32.mxu1 %vm4071_vm0, %v4072_v8 }
 0x4c2   :  { %3880 = vmatprep.subr.bf16.mxu1 %v4070_v2 }
 0x4c3   :  { %v921_v1 = vpop.f32.mrb[10].mxu0 }
 0x4c4   :  { %v3522_v3 = vpop.f32.mrb[11].mxu0  ;;  %v922_v29 = vadd.f32 %v3154_v28, %v921_v1 }
 0x4c5   :  { %3882 = vmatpush3.bf16.msra.mxu1 %v3881_v0 }
 0x4c6   :  { %3889 = vmatprep.subr.bf16.mxu1 %v4070_v2 }
 0x4c8   :  { %3532 = vmatmul.mubr.msk.f32.vlgmr.msra.gmra.mrb[10].mxu1 %vm195_vm3, %v4214_v51 }
 0x4c9   :  { %3891 = vmatpush3.bf16.msra.mxu1 %v3890_v49  ;;  %3553 = vmatprep.mubr.msk.f32.mxu1 %vm4071_vm0, %v4072_v8 }
 0x4ca   :  { %3892 = vmatprep.subr.bf16.mxu1 %v4070_v2 }
 0x4cb   :  { %v1079_v5 = vpop.f32.mrb[12].mxu0 }
 0x4cc   :  { %v1080_v6 = vadd.f32 %v3158_v4, %v1079_v5  ;;  %v3544_v7 = vpop.f32.mrb[13].mxu0 }
 0x4cd   :  { %3894 = vmatpush3.bf16.msra.mxu1 %v3893_v53 }
 0x4ce   :  { %3565 = vmatmul.mubr.msk.f32.vlgmr.msra.gmra.mrb[14].mxu0 %vm195_vm3, %v1080_v6  ;;  %3901 = vmatprep.subr.bf16.mxu1 %v4070_v2 }
 0x4cf   :  { %3586 = vmatprep.mubr.msk.f32.mxu0 %vm4071_vm0, %v4072_v8  ;;  %3909 = vmatpush3.bf16.msra.mxu0 %v3902_v11 }
 0x4d0   :  { %3910 = vmatprep.subr.bf16.mxu0 %v4070_v2 }
 0x4d3   :  { %3912 = vmatpush3.bf16.msra.mxu0 %v3905_v27 }
 0x4d4   :  { %3919 = vmatprep.subr.bf16.mxu0 %v4070_v2 }
 0x593   :  { %v842_v12 = vpop.f32.mrb[8].mxu1 }
 0x594   :  { %v3511_v13 = vpop.f32.mrb[9].mxu1  ;;  %v843_v20 = vadd.f32 %v3152_v15, %v842_v12  ;;  %v1882_v15 = vld [vmem:[%s4808_s3 + $0x190] sm:$0xff] }
 0x59b   :  { %v1000_v16 = vpop.f32.mrb[10].mxu1 }
 0x59c   :  { %v1001_v17 = vadd.f32 %v3156_v14, %v1000_v16  ;;  %v3533_v19 = vpop.f32.mrb[11].mxu1  ;;  %v1883_v16 = vld [vmem:[%s4808_s3 + $0x198] sm:$0xff] }
 0x59d   :  { %v1884_v19 = vld [vmem:[%s4808_s3 + $0x1a0] sm:$0xff] }
 0x59e   :  { %v1083_v21 = vmul.f32 0.35355338, %v1001_v17  ;;  %v3950_v17 = vpack.c.bf16 %v1883_v16, %v1882_v15 }
 0x5a0   :  { %v1084_v22 = vsub.f32 %v1083_v21, %v843_v20  ;;  %v1885_v20 = vld [vmem:[%s4808_s3 + $0x1a8] sm:$0xff] }
 0x5a1   :  { %v4404_v23 = vpop.f32.mrb[14].mxu0  ;;  %v3953_v21 = vpack.c.bf16 %v1885_v20, %v1884_v19 }
 0x5a2   :  { %3554 = vmatmul.mubr.msk.f32.vlgmr.msra.gmra.mrb[12].mxu1 %vm195_vm3, %v1084_v22  ;;  %v3566_v24 = vpop.f32.mrb[15].mxu0 }
 0x5a3   :  { %3903 = vmatpush3.bf16.msra.mxu1 %v3902_v11  ;;  %3575 = vmatprep.mubr.msk.f32.mxu1 %vm4071_vm0, %v4072_v8 }
 0x5a4   :  { %3904 = vmatprep.subr.bf16.mxu1 %v4070_v2 }
 0x5a7   :  { %3906 = vmatpush3.bf16.msra.mxu1 %v3905_v27 }
 0x5a8   :  { %3913 = vmatprep.subr.bf16.mxu1 %v4070_v2 }
 0x675   :  { %v1158_v30 = vpop.f32.mrb[12].mxu1 }
 0x676   :  { %v1243_v31 = vmul.f32 %v1158_v30, %v922_v29  ;;  %1395 = vrot.lane.b32.xlu1 %v1158_v30, %s4073_s24  ;;  %1318 = vrot.lane.b32.xlu0 %v1158_v30, %s4074_s25  ;;  %v3555_v32 = vpop.f32.mrb[13].mxu1 }
 0x678   :  { %3576 = vmatmul.mubr.msk.f32.vlgmr.msra.gmra.mrb[14].mxu1 %vm195_vm3, %v1243_v31 }
 0x679   :  { %3915 = vmatpush3.bf16.msra.mxu1 %v3902_v11  ;;  %3597 = vmatprep.mubr.msk.f32.mxu1 %vm4071_vm0, %v4072_v8 }
 0x67a   :  { %1472 = vrot.lane.b32.xlu1 %v1158_v30, %s4075_s2  ;;  %1719 = vrot.lane.b32.xlu0 %v4404_v23, %s4074_s25 }
 0x67b   :  { %3916 = vmatprep.subr.bf16.mxu1 %v4070_v2 }
 0x67d   :  { %3918 = vmatpush3.bf16.msra.mxu1 %v3905_v27 }
 0x67e   :  { %1798 = vrot.lane.b32.xlu1 %v4404_v23, %s4073_s24  ;;  %1877 = vrot.lane.b32.xlu0 %v4404_v23, %s4075_s2 }
 0x67f   :  { %3925 = vmatprep.subr.bf16.mxu1 %v4070_v2 }
 0x6e8   :  { %v1396_v33 = vpop.permute.xlu1 %1395  ;;  %v1319_v34 = vpop.permute.xlu0 %1318 }
 0x6e9   :  { %v1398_v35 = vmul.f32 %v1396_v33, %v922_v29  ;;  %v1321_v36 = vmul.f32 %v1319_v34, %v922_v29 }
 0x6eb   :  { %3587 = vmatmul.mubr.msk.f32.vlgmr.msra.gmra.mrb[16].mxu0 %vm195_vm3, %v1321_v36  ;;  %3598 = vmatmul.mubr.msk.f32.vlgmr.msra.gmra.mrb[16].mxu1 %vm195_vm3, %v1398_v35 }
 0x6ec   :  { %3921 = vmatpush3.bf16.msra.mxu0 %v3902_v11  ;;  %3608 = vmatprep.mubr.msk.f32.mxu0 %vm4071_vm0, %v4072_v8  ;;  %v1473_v37 = vpop.permute.xlu1 %1472  ;;  %v1720_v22 = vpop.permute.xlu0 %1719 }
 0x6ed   :  { %3922 = vmatprep.subr.bf16.mxu0 %v4070_v2  ;;  %3619 = vmatprep.mubr.msk.f32.mxu1 %vm4071_vm0, %v4072_v8  ;;  %v1475_v38 = vmul.f32 %v1473_v37, %v922_v29 }
 0x6ee   :  { %3927 = vmatpush3.bf16.msra.mxu1 %v3926_v44 }
 0x6ef   :  { %3928 = vmatprep.subr.bf16.mxu1 %v4070_v2 }
 0x6f0   :  { %3924 = vmatpush3.bf16.msra.mxu0 %v3905_v27  ;;  %v1799_v31 = vpop.permute.xlu1 %1798  ;;  %v1878_v37 = vpop.permute.xlu0 %1877 }
 0x6f1   :  { %3931 = vmatprep.subr.bf16.mxu0 %v4070_v2 }
 0x6f2   :  { %3930 = vmatpush3.bf16.msra.mxu1 %v3929_v46 }
 0x6f3   :  { %3609 = vmatmul.mubr.msk.f32.vlgmr.msra.gmra.mrb[18].mxu0 %vm195_vm3, %v1475_v38  ;;  %3937 = vmatprep.subr.bf16.mxu1 %v4070_v2 }
 0x6f4   :  { %3630 = vmatprep.mubr.msk.f32.mxu0 %vm4071_vm0, %v4072_v8  ;;  %3933 = vmatpush3.bf16.msra.mxu0 %v3926_v44 }
 0x6f5   :  { %3934 = vmatprep.subr.bf16.mxu0 %v4070_v2 }
 0x6f8   :  { %3936 = vmatpush3.bf16.msra.mxu0 %v3929_v46 }
 0x6f9   :  { %3943 = vmatprep.subr.bf16.mxu0 %v4070_v2 }
 0x74b   :  { %v1313_v39 = vpop.f32.mrb[14].mxu1 }
 0x74c   :  { %v3577_v40 = vpop.f32.mrb[15].mxu1 }
 0x7be   :  { %v1391_v47 = vpop.f32.mrb[16].mxu0  ;;  %v1468_v48 = vpop.f32.mrb[16].mxu1 }
 0x7bf   :  { %v1549_v49 = vmax.f32 %v1313_v39, %v1391_v47  ;;  %v3588_v50 = vpop.f32.mrb[17].mxu0  ;;  %v3599_v52 = vpop.f32.mrb[17].mxu1 }
 0x7c0   :  { %v1991_v52 = vld [vmem:[%s4812_s4] sm:$0xff] }
 0x7c1   :  { %v1550_v53 = vmax.f32 %v1549_v49, %v1468_v48 }
 0x7c6   :  { %v1545_v54 = vpop.f32.mrb[18].mxu0 }
 0x7c7   :  { %v1551_v55 = vmax.f32 %v1550_v53, %v1545_v54  ;;  %v3610_v56 = vpop.f32.mrb[19].mxu0  ;;  %v1992_v53 = vld [vmem:[%s4812_s4 + $0x8] sm:$0xff] }
 0x7c9   :  { %v1552_v57 = vsub.f32 %v1313_v39, %v1551_v55  ;;  %v1555_v58 = vsub.f32 %v1391_v47, %v1551_v55  ;;  %v1558_v59 = vsub.f32 %v1468_v48, %v1551_v55  ;;  %v1561_v60 = vsub.f32 %v1545_v54, %v1551_v55  ;;  %v1994_v55 = vld [vmem:[%s4812_s4 + $0x18] sm:$0xff] }
 0x7ca   :  { %v3956_v54 = vpack.c.bf16 %v1992_v53, %v1991_v52 }
 0x7cb   :  { %v1553_v61 = vmul.f32 1.442695, %v1552_v57  ;;  %v1556_v62 = vmul.f32 1.442695, %v1555_v58  ;;  %v1559_v63 = vmul.f32 1.442695, %v1558_v59 }
 0x7cc   :  { %v1562_v0 = vmul.f32 1.442695, %v1561_v60  ;;  %v2076_v57 = vld [vmem:[%s4808_s3 + $0x1b8] sm:$0xff]  ;;  %v2077_v58 = vld [vmem:[%s4808_s3 + $0x1c0] sm:$0xff]  ;;  %v2078_v59 = vld [vmem:[%s4808_s3 + $0x1c8] sm:$0xff] }
 0x7cd   :  { %4043 = vpow2.f32 %v1553_v61  ;;  %v3962_v60 = vpack.c.bf16 %v2077_v58, %v2076_v57  ;;  %v2079_v61 = vld [vmem:[%s4808_s3 + $0x1d0] sm:$0xff] }
 0x7ce   :  { %4045 = vpow2.f32 %v1556_v62  ;;  %v3965_v62 = vpack.c.bf16 %v2079_v61, %v2078_v59  ;;  %v2275_v58 = vld [vmem:[%s4808_s3 + $0x270] sm:$0xff]  ;;  %v2276_v59 = vld [vmem:[%s4808_s3 + $0x278] sm:$0xff] }
 0x7cf   :  { %4047 = vpow2.f32 %v1559_v63  ;;  %v2080_v63 = vld [vmem:[%s4808_s3 + $0x1d8] sm:$0xff] }
 0x7d0   :  { %4049 = vpow2.f32 %v1562_v0  ;;  %v2081_v0 = vld [vmem:[%s4808_s3 + $0x1e0] sm:$0xff] }
 0x7d7   :  { %v4044_v1 = vpop.eup %4043 }
 0x7d8   :  { %v4046_v3 = vpop.eup %4045 }
 0x7d9   :  { %v1564_v4 = vadd.f32 %v4046_v3, %v4044_v1  ;;  %v4048_v5 = vpop.eup %4047 }
 0x7da   :  { %v4050_v7 = vpop.eup %4049 }
 0x7db   :  { %v1565_v6 = vadd.f32 %v4048_v5, %v1564_v4  ;;  %v2083_v4 = vld [vmem:[%s4808_s3 + $0x1f0] sm:$0xff] }
 0x7dd   :  { %v1566_v9 = vadd.f32 %v4050_v7, %v1565_v6  ;;  %v2084_v6 = vld [vmem:[%s4808_s3 + $0x1f8] sm:$0xff] }
 0x7df   :  { %4051 = vrcp.f32 %v1566_v9 }
 0x7e9   :  { %v4052_v10 = vpop.eup %4051 }
 0x7ea   :  { %v1568_v11 = vmul.f32 %v4052_v10, %v4044_v1  ;;  %v1644_v12 = vmul.f32 %v4052_v10, %v4046_v3  ;;  %v1724_v13 = vmul.f32 %v4052_v10, %v4048_v5  ;;  %v1803_v14 = vmul.f32 %v4052_v10, %v4050_v7  ;;  %v2082_v3 = vld [vmem:[%s4808_s3 + $0x1e8] sm:$0xff]  ;;  %v2085_v7 = vld [vmem:[%s4808_s3 + $0x200] sm:$0xff] }
 0x7eb   :  { %v3968_v1 = vpack.c.bf16 %v2081_v0, %v2080_v63  ;;  %v3971_v5 = vpack.c.bf16 %v2083_v4, %v2082_v3  ;;  %v3974_v9 = vpack.c.bf16 %v2085_v7, %v2084_v6  ;;  %v2086_v10 = vld [vmem:[%s4808_s3 + $0x208] sm:$0xff]  ;;  %v2277_v0 = vld [vmem:[%s4808_s3 + $0x280] sm:$0xff]  ;;  %v4630_v4 = vld [vmem:[%s4808_s3 + $0x378] sm:$0xff] }
 0x7ec   :  { %3620 = vmatmul.mubr.msk.f32.vlgmr.msra.gmra.mrb[18].mxu1 %vm195_vm3, %v1568_v11  ;;  %3631 = vmatmul.mubr.msk.f32.vlgmr.msra.gmra.mrb[20].mxu0 %vm195_vm3, %v1644_v12  ;;  %v2087_v11 = vld [vmem:[%s4808_s3 + $0x210] sm:$0xff]  ;;  %v2646_v6 = vld [vmem:[%s4808_s3 + $0x2a0] sm:$0xff] }
 0x7ed   :  { %3939 = vmatpush3.bf16.msra.mxu1 %v3926_v44  ;;  %3945 = vmatpush3.bf16.msra.mxu0 %v3926_v44  ;;  %v3977_v12 = vpack.c.bf16 %v2087_v11, %v2086_v10 }
 0x7ee   :  { %3940 = vmatprep.subr.bf16.mxu1 %v4070_v2  ;;  %3946 = vmatprep.subr.bf16.mxu0 %v4070_v2 }
 0x7ef   :  { %3641 = vmatprep.mubr.msk.f32.mxu1 %vm4071_vm0, %v4072_v8  ;;  %3652 = vmatprep.mubr.msk.f32.mxu0 %vm4071_vm0, %v4072_v8 }
 0x7f1   :  { %3942 = vmatpush3.bf16.msra.mxu1 %v3929_v46  ;;  %3948 = vmatpush3.bf16.msra.mxu0 %v3929_v46 }
 0x7f2   :  { %3949 = vmatprep.subr.bf16.mxu1 %v4070_v2  ;;  %3955 = vmatprep.subr.bf16.mxu0 %v4070_v2 }
 0x7f4   :  { %3642 = vmatmul.mubr.msk.f32.vlgmr.msra.gmra.mrb[20].mxu1 %vm195_vm3, %v1724_v13  ;;  %3653 = vmatmul.mubr.msk.f32.vlgmr.msra.gmra.mrb[22].mxu0 %vm195_vm3, %v1803_v14  ;;  %v2088_v13 = vld [vmem:[%s4808_s3 + $0x218] sm:$0xff]  ;;  %v2089_v14 = vld [vmem:[%s4808_s3 + $0x220] sm:$0xff] }
 0x7f5   :  { %3663 = vmatprep.mubr.msk.f32.mxu1 %vm4071_vm0, %v4072_v8  ;;  %3674 = vmatprep.mubr.msk.f32.mxu0 %vm4071_vm0, %v4072_v8  ;;  %v3980_v15 = vpack.c.bf16 %v2089_v14, %v2088_v13  ;;  %v4648_v14 = vld [vmem:[%s4808_s3 + $0x388] sm:$0xff] }
 0x7f6   :  { %3951 = vmatpush3.bf16.msra.mxu1 %v3950_v17  ;;  %3957 = vmatpush3.bf16.msra.mxu0 %v3956_v54 }
 0x7f7   :  { %3952 = vmatprep.subr.bf16.mxu1 %v4070_v2  ;;  %3958 = vmatprep.subr.bf16.mxu0 %v4070_v2 }
 0x7fa   :  { %3954 = vmatpush3.bf16.msra.mxu1 %v3953_v21  ;;  %v3172_v21 = vld [vmem:[%s4808_s3 + $0x240] ss:$0 sm:$0xff] }
 0x7fb   :  { %3961 = vmatprep.subr.bf16.mxu1 %v4070_v2 }
 0x8bf   :  { %v1638_v24 = vpop.f32.mrb[18].mxu1  ;;  %v1714_v25 = vpop.f32.mrb[20].mxu0 }
 0x8c0   :  { %v1642_v26 = vmul.f32 %v1638_v24, %v4404_v23  ;;  %v1722_v27 = vmul.f32 %v1720_v22, %v1714_v25  ;;  %v3621_v28 = vpop.f32.mrb[19].mxu1  ;;  %v3632_v29 = vpop.f32.mrb[21].mxu0  ;;  %v3170_v23 = vld [vmem:[%s4808_s3 + $0x1b3] ss:$0 sm:$0xff]  ;;  %v3173_v24 = vld [vmem:[%s4808_s3 + $0x248] ss:$0 sm:$0xff] }
 0x8c1   :  { %v2091_v28 = vld [vmem:[%s4808_s3 + $0x230] sm:$0xff] }
 0x8c2   :  { %v1723_v30 = vadd.f32 %v1722_v27, %v1642_v26  ;;  %v2090_v27 = vld [vmem:[%s4808_s3 + $0x228] sm:$0xff] }
 0x8c3   :  { %v3983_v29 = vpack.c.bf16 %v2091_v28, %v2090_v27  ;;  %v2354_v27 = vld [vmem:[%s4808_s3 + $0x360] sm:$0xff]  ;;  %v2355_v28 = vld [vmem:[%s4808_s3 + $0x368] sm:$0xff] }
 0x8c7   :  { %v1794_v32 = vpop.f32.mrb[20].mxu1  ;;  %v1873_v33 = vpop.f32.mrb[22].mxu0 }
 0x8c8   :  { %v1801_v34 = vmul.f32 %v1799_v31, %v1794_v32  ;;  %v3643_v35 = vpop.f32.mrb[21].mxu1  ;;  %v3654_v36 = vpop.f32.mrb[23].mxu0  ;;  %v1880_v39 = vmul.f32 %v1878_v37, %v1873_v33 }
 0x8c9   :  { %v3176_v36 = vld [vmem:[%s4808_s3 + $0x238] ss:$0 sm:$0xff] }
 0x8ca   :  { %v1802_v38 = vadd.f32 %v1801_v34, %v1723_v30  ;;  %v3174_v30 = vld [vmem:[%s4812_s4 + $0x20] ss:$0 sm:$0xff] }
 0x8cc   :  { %v1881_v40 = vadd.f32 %v1880_v39, %v1802_v38 }
 0x8ce   :  { %3664 = vmatmul.mubr.msk.f32.vlgmr.msra.gmra.mrb[22].mxu1 %vm195_vm3, %v1881_v40 }
 0x8cf   :  { %3709 = vmatprep.mubr.msk.f32.mxu1 %vm4071_vm0, %v4072_v8  ;;  %3963 = vmatpush3.bf16.msra.mxu1 %v3962_v60  ;;  %v3178_v60 = vld [vmem:[%s4808_s3 + $0x249] ss:$0 sm:$0xff] }
 0x8d0   :  { %3964 = vmatprep.subr.bf16.mxu1 %v4070_v2 }
 0x8d3   :  { %3966 = vmatpush3.bf16.msra.mxu1 %v3965_v62  ;;  %v3992_v62 = vpack.c.bf16 %v2276_v59, %v2275_v58 }
 0x8d4   :  { %3967 = vmatprep.subr.bf16.mxu1 %v4070_v2 }
 0x8d7   :  { %3969 = vmatpush3.bf16.msra.mxu1 %v3968_v1  ;;  %v2278_v1 = vld [vmem:[%s4808_s3 + $0x288] sm:$0xff] }
 0x8d8   :  { %3970 = vmatprep.subr.bf16.mxu1 %v4070_v2  ;;  %v3995_v3 = vpack.c.bf16 %v2278_v1, %v2277_v0 }
 0x8db   :  { %3972 = vmatpush3.bf16.msra.mxu1 %v3971_v5  ;;  %v2645_v5 = vld [vmem:[%s4808_s3 + $0x298] sm:$0xff] }
 0x8dc   :  { %3973 = vmatprep.subr.bf16.mxu1 %v4070_v2  ;;  %v3997_v7 = vpack.c.bf16 %v2646_v6, %v2645_v5  ;;  %v2779_v6 = vld [vmem:[%s4808_s3 + $0x2b8] sm:$0x1] }
 0x8dd   :  { %4031 = vpush %v2779_v6 }
 0x8df   :  { %3975 = vmatpush3.bf16.msra.mxu1 %v3974_v9 }
 0x8e0   :  { %3976 = vmatprep.subr.bf16.mxu1 %v4070_v2 }
 0x8e3   :  { %3978 = vmatpush3.bf16.msra.mxu1 %v3977_v12  ;;  %v4643_v12 = vld [vmem:[%s4808_s3 + $0x380] sm:$0xff] }
 0x8e4   :  { %3979 = vmatprep.subr.bf16.mxu1 %v4070_v2 }
 0x8e7   :  { %3981 = vmatpush3.bf16.msra.mxu1 %v3980_v15  ;;  %v4657_v15 = vld [vmem:[%s4808_s3 + $0x390] sm:$0xff] }
 0x8e8   :  { %3982 = vmatprep.subr.bf16.mxu1 %v4070_v2 }
 0x8eb   :  { %3984 = vmatpush3.bf16.msra.mxu1 %v3983_v29  ;;  %v2356_v29 = vld [vmem:[%s4808_s3 + $0x370] sm:$0xff] }
 0x8ec   :  { %3998 = vmatprep.subr.bf16.mxu1 %v3997_v7 }
 0x90e   :  { %s4032_s11 = spop %4031 }
 0x9a1   :  { %v1960_v41 = vpop.f32.mrb[22].mxu1 }
 0x9a2   :  { %v1961_v42 = vadd.f32 %v3170_v23, %v1960_v41  ;;  %v3665_v43 = vpop.f32.mrb[23].mxu1 }
 0x9a4   :  { %v1964_v44 = vadd.f32 %v1961_v42, %v4214_v51  ;;  %v1993_v51 = vld [vmem:[%s4812_s4 + $0x10] sm:$0xff] }
 0x9a5   :  { %v3959_v56 = vpack.c.bf16 %v1994_v55, %v1993_v51 }
 0x9a6   :  { %v1965_v45 = vsel %vm195_vm3, %v1964_v44, 0.0 }
 0x9a7   :  { %1966 = vadd.xlane.f32.xlu1 %v1965_v45  ;;  %3960 = vmatpush3.bf16.msra.mxu0 %v3959_v56  ;;  %v3177_v56 = vld [vmem:[%s4808_s3 + $0x241] ss:$0 sm:$0xff] }
 0x9a8   :  { %3985 = vmatprep.subr.bf16.mxu0 %v4070_v2 }
 0xa34   :  { %v1967_v46 = vpop.xlane.xlu1 %1966 }
 0xa35   :  { %v1969_v47 = vmul.f32 0.03125, %v1967_v46  ;;  %v2199_v46 = vld [vmem:[%s4808_s3 + $0x250] sm:$0xff] }
 0xa37   :  { %v1970_v48 = vsub.f32 %v1964_v44, %v1969_v47  ;;  %v2200_v47 = vld [vmem:[%s4808_s3 + $0x258] sm:$0xff] }
 0xa39   :  { %v1971_v49 = vmul.f32 %v1970_v48, %v1970_v48 }
 0xa3b   :  { %v1972_v50 = vsel %vm195_vm3, %v1971_v49, 0.0  ;;  %v2201_v49 = vld [vmem:[%s4808_s3 + $0x260] sm:$0xff] }
 0xa3c   :  { %1973 = vadd.xlane.f32.xlu0 %v1972_v50  ;;  %v2202_v50 = vld [vmem:[%s4808_s3 + $0x268] sm:$0xff] }
 0xa3d   :  { %v3989_v52 = vpack.c.bf16 %v2202_v50, %v2201_v49 }
 0xac9   :  { %v1974_v16 = vpop.xlane.xlu0 %1973 }
 0xaca   :  { %v1975_v17 = vmul.f32 0.03125, %v1974_v16  ;;  %v4662_v16 = vld [vmem:[%s4808_s3 + $0x398] sm:$0xff] }
 0xacc   :  { %v1976_v19 = vadd.f32 1e-05, %v1975_v17  ;;  %v4672_v17 = vld [vmem:[%s4808_s3 + $0x3a0] sm:$0xff] }
 0xace   :  { %4053 = vrsqrt.f32 %v1976_v19  ;;  %v4677_v19 = vld [vmem:[%s4808_s3 + $0x3a8] sm:$0xff] }
 0xad8   :  { %v4054_v20 = vpop.eup %4053 }
 0xad9   :  { %v1978_v22 = vmul.f32 %v4054_v20, %v1970_v48  ;;  %v3986_v48 = vpack.c.bf16 %v2200_v47, %v2199_v46  ;;  %v4686_v20 = vld [vmem:[%s4808_s3 + $0x3b0] sm:$0xff] }
 0xadb   :  { %v1984_v25 = vmul.f32 %v3172_v21, %v1978_v22  ;;  %v2349_v21 = vld [vmem:[%s4808_s3 + $0x338] sm:$0xff]  ;;  %v2350_v22 = vld [vmem:[%s4808_s3 + $0x340] sm:$0xff] }
 0xadd   :  { %v1990_v26 = vadd.f32 %v3173_v24, %v1984_v25  ;;  %v2351_v24 = vld [vmem:[%s4808_s3 + $0x348] sm:$0xff]  ;;  %v2352_v25 = vld [vmem:[%s4808_s3 + $0x350] sm:$0xff] }
 0xadf   :  { %3675 = vmatmul.mubr.msk.f32.vlgmr.msra.gmra.mrb[24].mxu0 %vm195_vm3, %v1990_v26 }
 0xae0   :  { %3720 = vmatprep.mubr.msk.f32.mxu0 %vm4071_vm0, %v4072_v8  ;;  %3987 = vmatpush3.bf16.msra.mxu0 %v3986_v48 }
 0xae1   :  { %3988 = vmatprep.subr.bf16.mxu0 %v4070_v2 }
 0xae4   :  { %3990 = vmatpush3.bf16.msra.mxu0 %v3989_v52 }
 0xae5   :  { %3991 = vmatprep.subr.bf16.mxu0 %v4070_v2 }
 0xbb2   :  { %v2069_v31 = vpop.f32.mrb[24].mxu0 }
 0xbb3   :  { %v2070_v32 = vadd.f32 %v3174_v30, %v2069_v31  ;;  %v3676_v33 = vpop.f32.mrb[25].mxu0  ;;  %v2647_v30 = vld [vmem:[%s4808_s3 + $0x2a8] sm:$0xff]  ;;  %v2648_v31 = vld [vmem:[%s4808_s3 + $0x2b0] sm:$0xff] }
 0xbb4   :  { %v3197_v33 = vld [vmem:[%s4808_s3 + $0x290] ss:$0 sm:$0xff] }
 0xbb5   :  { %vm2073_vm4 = vcmp.gt.f32.partialorder %v2070_v32, 0.0  ;;  %v2074_v34 = vmul.f32 0.01, %v2070_v32 }
 0xbb7   :  { %v2075_v35 = vsel %vm2073_vm4, %v2070_v32, %v2074_v34  ;;  %v4001_v32 = vpack.c.bf16 %v2648_v31, %v2647_v30 }
 0xbb8   :  { %3710 = vmatmul.mubr.f32.vlgmr.msra.gmra.mrb[24].mxu1 %v2075_v35 }
 0xbb9   :  { %4000 = vmatpush3.bf16.msra.mxu1 %v3997_v7 }
 0xbba   :  { %4002 = vmatprep.subr.bf16.mxu1 %v4001_v32 }
 0xbbd   :  { %4004 = vmatpush3.bf16.msra.mxu1 %v4001_v32  ;;  %v3018_v32 = vld [vmem:[%s4808_s3 + $0x2c0] sm:$0xff] }
 0xbbe   :  { %4005 = vmatprep.subr.bf16.mxu1 %v4070_v2 }
 0xc8b   :  { %v2163_v37 = vpop.f32.mrb[24].mxu1 }
 0xc8c   :  { %v2164_v38 = vadd.f32 %v3176_v36, %v2163_v37  ;;  %v3711_v39 = vpop.f32.mrb[25].mxu1 }
 0xc8e   :  { %v2167_v40 = vadd.f32 %v2164_v38, %v1990_v26  ;;  %v2353_v26 = vld [vmem:[%s4808_s3 + $0x358] sm:$0xff] }
 0xc90   :  { %v2168_v23 = vsel %vm195_vm3, %v2167_v40, 0.0 }
 0xc91   :  { %2169 = vadd.xlane.f32.xlu0 %v2168_v23 }
 0xd1e   :  { %v2170_v41 = vpop.xlane.xlu0 %2169 }
 0xd1f   :  { %v2171_v42 = vmul.f32 0.03125, %v2170_v41 }
 0xd21   :  { %v2172_v43 = vsub.f32 %v2167_v40, %v2171_v42 }
 0xd23   :  { %v2173_v44 = vmul.f32 %v2172_v43, %v2172_v43 }
 0xd25   :  { %v2174_v45 = vsel %vm195_vm3, %v2173_v44, 0.0 }
 0xd26   :  { %2175 = vadd.xlane.f32.xlu1 %v2174_v45 }
 0xdb3   :  { %v2176_v53 = vpop.xlane.xlu1 %2175 }
 0xdb4   :  { %v2177_v54 = vmul.f32 0.03125, %v2176_v53 }
 0xdb6   :  { %v2178_v51 = vadd.f32 1e-05, %v2177_v54 }
 0xdb8   :  { %4055 = vrsqrt.f32 %v2178_v51 }
 0xdc2   :  { %v4056_v55 = vpop.eup %4055 }
 0xdc3   :  { %v2180_v57 = vmul.f32 %v4056_v55, %v2172_v43 }
 0xdc5   :  { %v2186_v61 = vmul.f32 %v3177_v56, %v2180_v57 }
 0xdc7   :  { %v4612_v63 = vadd.f32 %v3178_v60, %v2186_v61 }
 0xdc9   :  { %3721 = vmatmul.mubr.msk.f32.vlgmr.msra.gmra.mrb[26].mxu0 %vm195_vm3, %v4612_v63 }
 0xdca   :  { %3993 = vmatpush3.bf16.msra.mxu0 %v3992_v62  ;;  %3731 = vmatprep.mubr.msk.f32.mxu0 %vm4071_vm0, %v4072_v8 }
 0xdcb   :  { %3994 = vmatprep.subr.bf16.mxu0 %v4070_v2 }
 0xdce   :  { %3996 = vmatpush3.bf16.msra.mxu0 %v3995_v3  ;;  %v2918_v3 = vmul.f32 %v4612_v63, %v4612_v63 }
 0xdd0   :  { %v2919_v5 = vsel %vm195_vm3, %v2918_v3, 0.0 }
 0xdd1   :  { %3732 = vmatmul.mubr.msk.f32.vlgmr.msra.gmra.mrb[28].mxu0 %vm195_vm3, %v4612_v63 }
 0xdd2   :  { %3736 = vmatprep.mubr.msk.f32.mxu0 %vm2365_vm5, %v4630_v4 }
 0xe9c   :  { %v2271_v9 = vpop.f32.mrb[26].mxu0 }
 0xe9d   :  { %v3722_v10 = vpop.f32.mrb[27].mxu0 }
 0xea4   :  { %v2345_v11 = vpop.f32.mrb[28].mxu0 }
 0xea5   :  { %v3733_v13 = vpop.f32.mrb[29].mxu0  ;;  %3734 = vmatprep.subr.mxu0 %v2345_v11 }
 0xea6   :  { %3735 = vmatpush3.msra.mxu0 %v2345_v11 }
 0xea7   :  { %3737 = vmatmul.mubr.msk.f32.vlgmr.msra.gmra.mrb[30].mxu0 %vm2365_vm5, %v4643_v12  ;;  %3748 = vmatprep.subr.mxu0 %v2271_v9 }
 0xea8   :  { %3749 = vmatpush3.msra.mxu0 %v2271_v9  ;;  %3739 = vmatprep.mubr.msk.f32.mxu0 %vm2365_vm5, %v4648_v14 }
 0xea9   :  { %3801 = vmatprep.subr.mxu0 %v4072_v8 }
 0xeab   :  { %3740 = vmatmul.mubr.msk.f32.gmra.mrb[32].mxu0 %vm2365_vm5, %v4657_v15 }
 0xeac   :  { %3742 = vmatprep.mubr.msk.f32.mxu0 %vm2365_vm5, %v4662_v16 }
 0xeaf   :  { %3743 = vmatmul.mubr.msk.f32.gmra.mrb[34].mxu0 %vm2365_vm5, %v4672_v17 }
 0xeb0   :  { %3745 = vmatprep.mubr.msk.f32.mxu0 %vm2365_vm5, %v4677_v19 }
 0xeb3   :  { %3746 = vmatmul.mubr.msk.f32.gmra.mrb[36].mxu0 %vm2365_vm5, %v4686_v20 }
 0xeb4   :  { %3750 = vmatprep.mubr.msk.f32.mxu0 %vm2365_vm5, %v2349_v21 }
 0xeb7   :  { %3751 = vmatmul.mubr.msk.f32.vlgmr.msra.gmra.mrb[30].mxu0 %vm2365_vm5, %v2350_v22 }
 0xeb8   :  { %3753 = vmatprep.mubr.msk.f32.mxu0 %vm2365_vm5, %v2351_v24 }
 0xebb   :  { %3754 = vmatmul.mubr.msk.f32.gmra.mrb[32].mxu0 %vm2365_vm5, %v2352_v25 }
 0xebc   :  { %3756 = vmatprep.mubr.msk.f32.mxu0 %vm2365_vm5, %v2353_v26 }
 0xebf   :  { %3757 = vmatmul.mubr.msk.f32.gmra.mrb[34].mxu0 %vm2365_vm5, %v2354_v27 }
 0xec0   :  { %3759 = vmatprep.mubr.msk.f32.mxu0 %vm2365_vm5, %v2355_v28 }
 0xec3   :  { %3760 = vmatmul.mubr.msk.f32.gmra.mrb[36].mxu0 %vm2365_vm5, %v2356_v29 }
 0xec4   :  { %3803 = vmatprep.mubr.msk.f32.mxu0 %vm4071_vm0, %v4072_v8 }
 0xf8a   :  { %v3752_v34 = vpop.f32.mrb[30].mxu0 }
 0xf8b   :  { %v2630_v35 = vadd.f32 %v3752_v34, %v3197_v33  ;;  %v2585_v36 = vpop.f32.mrb[31].mxu0  ;;  %v3021_v34 = vld [vmem:[%s4808_s3 + $0x2d8] sm:$0xff] }
 0xf8c   :  { %v2629_v37 = vadd.f32 %v3197_v33, %v2585_v36 }
 0xf8d   :  { %v2638_v40 = vmax.f32 %v2630_v35, 0.0 }
 0xf8e   :  { %v2637_v38 = vmax.f32 %v2629_v37, 0.0  ;;  %v3755_v39 = vpop.f32.mrb[32].mxu0 }
 0xf8f   :  { %v2632_v23 = vadd.f32 %v3755_v39, %v3197_v33  ;;  %v2595_v41 = vpop.f32.mrb[33].mxu0 }
 0xf90   :  { %v2631_v42 = vadd.f32 %v3197_v33, %v2595_v41  ;;  %3770 = vmatprep.mubr.msk.f32.mxu1 %vm195_vm3, %v2637_v38 }
 0xf91   :  { %3771 = vmatmul.mubr.msk.f32.vlgmr.msra.gmra.mrb[26].mxu1 %vm195_vm3, %v2638_v40  ;;  %v2640_v45 = vmax.f32 %v2632_v23, 0.0 }
 0xf92   :  { %v2639_v43 = vmax.f32 %v2631_v42, 0.0  ;;  %v3758_v44 = vpop.f32.mrb[34].mxu0 }
 0xf93   :  { %v2634_v46 = vadd.f32 %v3758_v44, %v3197_v33  ;;  %v2605_v47 = vpop.f32.mrb[35].mxu0 }
 0xf94   :  { %v2633_v48 = vadd.f32 %v3197_v33, %v2605_v47  ;;  %3773 = vmatprep.mubr.msk.f32.mxu1 %vm195_vm3, %v2639_v43 }
 0xf95   :  { %3774 = vmatmul.mubr.msk.f32.gmra.mrb[28].mxu1 %vm195_vm3, %v2640_v45  ;;  %v2642_v52 = vmax.f32 %v2634_v46, 0.0  ;;  %v3211_v46 = vld [vmem:[%s4808_s3 + $0x2e0] ss:$0 sm:$0xff] }
 0xf96   :  { %v2641_v49 = vmax.f32 %v2633_v48, 0.0  ;;  %v3761_v50 = vpop.f32.mrb[36].mxu0 }
 0xf97   :  { %v2636_v53 = vadd.f32 %v3761_v50, %v3197_v33  ;;  %v2615_v54 = vpop.f32.mrb[37].mxu0 }
 0xf98   :  { %v2635_v51 = vadd.f32 %v3197_v33, %v2615_v54  ;;  %3776 = vmatprep.mubr.msk.f32.mxu1 %vm195_vm3, %v2641_v49  ;;  %v2778_v33 = vld [vmem:[%s4812_s4 + $0x48] sm:$0xff] }
 0xf99   :  { %3777 = vmatmul.mubr.msk.f32.gmra.mrb[30].mxu1 %vm195_vm3, %v2642_v52  ;;  %v2644_v56 = vmax.f32 %v2636_v53, 0.0 }
 0xf9a   :  { %v2643_v55 = vmax.f32 %v2635_v51, 0.0 }
 0xf9c   :  { %3779 = vmatprep.mubr.msk.f32.mxu1 %vm195_vm3, %v2643_v55 }
 0xf9d   :  { %3780 = vmatmul.mubr.msk.f32.gmra.mrb[32].mxu1 %vm195_vm3, %v2644_v56 }
 0xf9e   :  { %3798 = vmatprep.mubr.msk.f32.mxu1 %vm4071_vm0, %v4072_v8 }
0x1064   :  { %v3772_v57 = vpop.f32.mrb[26].mxu1 }
0x1065   :  { %2787 = vperm.xlu1 %4042, %v3772_v57   ;;  %v2739_v58 = vpop.f32.mrb[27].mxu1 }
0x1066   :  { %2782 = vperm.xlu0 %4041, %v2739_v58  }
0x1068   :  { %v3775_v59 = vpop.f32.mrb[28].mxu1 }
0x1069   :  { %v2749_v60 = vpop.f32.mrb[29].mxu1 }
0x106a   :  { %2797 = vperm.xlu0 %4041, %v3775_v59   ;;  %2792 = vperm.xlu1 %4042, %v2749_v60   ;;  %v2830_v59 = vstv %s4032_s11 }
0x106c   :  { %v3778_v61 = vpop.f32.mrb[30].mxu1 }
0x106d   :  { %v2759_v62 = vpop.f32.mrb[31].mxu1 }
0x106e   :  { %2807 = vperm.xlu0 %4041, %v3778_v61   ;;  %2802 = vperm.xlu1 %4042, %v2759_v62  }
0x1070   :  { %v3781_v0 = vpop.f32.mrb[32].mxu1 }
0x1071   :  { %v2769_v1 = vpop.f32.mrb[33].mxu1 }
0x1072   :  { %2817 = vperm.xlu0 %4041, %v3781_v0   ;;  %2812 = vperm.xlu1 %4042, %v2769_v1  }
0x1096   :  { %2920 = vadd.xlane.f32.xlu1 %v2919_v5 }
0x10a7   :  { %2194 = vrot.lane.b32.xlu1 %v4612_v63, %s4075_s2 }
0x10e4   :  { %v2788_v7 = vpop.permute.xlu1 %2787 }
0x10e5   :  { %v2821_v9 = vmul.f32 %v2788_v7, %v4643_v12  ;;  %v2783_v10 = vpop.permute.xlu0 %2782 }
0x10e6   :  { %v2820_v11 = vmul.f32 %v2783_v10, %v4630_v4 }
0x10e8   :  { %v4006_v13 = vpack.c.bf16 %v2821_v9, %v2820_v11 }
0x10e9   :  { %v2798_v21 = vpop.permute.xlu0 %2797  ;;  %v2793_v22 = vpop.permute.xlu1 %2792 }
0x10ea   :  { %v2823_v24 = vmul.f32 %v2798_v21, %v4657_v15  ;;  %v2822_v25 = vmul.f32 %v2793_v22, %v4648_v14  ;;  %4007 = vmatpush3.bf16.msra.mxu1 %v4006_v13 }
0x10eb   :  { %4008 = vmatprep.subr.bf16.mxu1 %v4070_v2 }
0x10ec   :  { %v4009_v26 = vpack.c.bf16 %v2823_v24, %v2822_v25 }
0x10ed   :  { %v2808_v27 = vpop.permute.xlu0 %2807  ;;  %v2803_v28 = vpop.permute.xlu1 %2802 }
0x10ee   :  { %v2825_v29 = vmul.f32 %v2808_v27, %v4672_v17  ;;  %v2824_v12 = vmul.f32 %v2803_v28, %v4662_v16  ;;  %4010 = vmatpush3.bf16.msra.mxu1 %v4009_v26  ;;  %v3019_v16 = vld [vmem:[%s4808_s3 + $0x2c8] sm:$0xff] }
0x10ef   :  { %4011 = vmatprep.subr.bf16.mxu1 %v4070_v2 }
0x10f0   :  { %v4012_v4 = vpack.c.bf16 %v2825_v29, %v2824_v12 }
0x10f1   :  { %v2818_v30 = vpop.permute.xlu0 %2817  ;;  %v2813_v31 = vpop.permute.xlu1 %2812 }
0x10f2   :  { %v2827_v15 = vmul.f32 %v2818_v30, %v4686_v20  ;;  %v2826_v14 = vmul.f32 %v2813_v31, %v4677_v19  ;;  %4013 = vmatpush3.bf16.msra.mxu1 %v4012_v4  ;;  %v4018_v20 = vpack.c.bf16 %v3019_v16, %v3018_v32  ;;  %v3020_v19 = vld [vmem:[%s4808_s3 + $0x2d0] sm:$0xff] }
0x10f3   :  { %4014 = vmatprep.subr.bf16.mxu1 %v4070_v2  ;;  %v4021_v35 = vpack.c.bf16 %v3021_v34, %v3020_v19 }
0x10f4   :  { %v4015_v17 = vpack.c.bf16 %v2827_v15, %v2826_v14 }
0x10f6   :  { %4016 = vmatpush3.bf16.msra.mxu1 %v4015_v17 }
0x10f7   :  { %4017 = vmatprep.subr.bf16.mxu1 %v4070_v2 }
0x10f9   :  { %3799 = vmatmul.mubr.msk.f32.vlgmr.msra.gmra.mrb[34].mxu1 %vm2832_vm6, %v2778_v33 }
0x10fa   :  { %4019 = vmatpush3.bf16.msra.mxu1 %v4018_v20  ;;  %3814 = vmatprep.mubr.msk.f32.mxu1 %vm4071_vm0, %v4072_v8 }
0x10fb   :  { %4020 = vmatprep.subr.bf16.mxu1 %v4070_v2 }
0x10fe   :  { %4022 = vmatpush3.bf16.msra.mxu1 %v4021_v35 }
0x1101   :  { %3815 = vmatmul.mubr.msk.f32.vlgmr.msra.gmra.mrb[36].mxu1 %vm195_vm3, %v4612_v63 }
0x1123   :  { %v2921_v36 = vpop.xlane.xlu1 %2920 }
0x1124   :  { %4057 = vrsqrt.f32 %v2921_v36  ;;  %vm2924_vm8 = vcmp.eq.f32.partialorder %v2921_v36, inf  ;;  %v2927_v40 = vand.u32 2147483648, %v2921_v36  ;;  %vm2926_vm9 = vcmp.eq.f32.partialorder %v2921_v36, 0.0 }
0x1127   :  { %v2195_v37 = vpop.permute.xlu1 %2194 }
0x1128   :  { %2198 = vst.msk [vmem:[%s4810_s5] sm:$0xff] %vm2197_vm7, %v2195_v37 }
0x112e   :  { %v4058_v38 = vpop.eup %4057 }
0x112f   :  { %v2923_v39 = vmul.f32 %v4058_v38, %v2921_v36 }
0x1131   :  { %v2925_v23 = vsel %vm2924_vm8, %v2921_v36, %v2923_v39 }
0x1132   :  { %v2928_v41 = vsel %vm2926_vm9, %v2927_v40, %v2925_v23 }
0x1133   :  { %v2929_v2 = vmax.f32 %v2928_v41, 1e-08 }
0x1135   :  { %4059 = vrcp.f32 %v2929_v2 }
0x113f   :  { %v4060_v42 = vpop.eup %4059 }
0x1140   :  { %v2931_v43 = vmul.f32 %v4060_v42, %v4612_v63 }
0x1142   :  { %3802 = vmatpush3.xpose.msk.msra.mxu0 %vm195_vm3, %v2931_v43 }
0x1145   :  { %3804 = vmatmul.mubr.msk.f32.vlgmr.msra.gmra.mrb[38].mxu0 %vm195_vm3, %v2931_v43 }
0x11cc   :  { %v2902_v44 = vpop.f32.mrb[34].mxu1 }
0x11cd   :  { %v3800_v45 = vpop.f32.mrb[35].mxu1  ;;  %v2903_v61 = vadd.f32 %v2902_v44, %v2830_v59 }
0x11cf   :  { %v3207_v0 = vmul.f32 -1.442695, %v2903_v61 }
0x11d4   :  { %v3093_v47 = vpop.f32.mrb[36].mxu1 }
0x11d5   :  { %v3094_v48 = vadd.f32 %v3211_v46, %v3093_v47  ;;  %v3816_v49 = vpop.f32.mrb[37].mxu1 }
0x11d7   :  { %v3213_v50 = vmul.f32 -1.442695, %v3094_v48 }
0x11d9   :  { %4061 = vpow2.f32 %v3213_v50 }
0x11e3   :  { %v4062_v52 = vpop.eup %4061 }
0x11e4   :  { %v3100_v53 = vadd.f32 1.0, %v4062_v52 }
0x11e6   :  { %4063 = vrcp.f32 %v3100_v53 }
0x11e7   :  { %4065 = vpow2.f32 %v3207_v0 }
0x11f0   :  { %v4064_v54 = vpop.eup %4063 }
0x11f1   :  { %vm3103_vm10 = vcmp.gt.f32.partialorder %v4064_v54, 0.5  ;;  %v4066_v9 = vpop.eup %4065 }
0x11f2   :  { %v3214_v63 = vsel %vm3103_vm10, 1.0, %v4072_v8  ;;  %v2909_v10 = vadd.f32 1.0, %v4066_v9 }
0x11f3   :  { %v3106_v51 = vsel %vm195_vm3, %v3214_v63, 0.0 }
0x11f4   :  { %v3107_v55 = vrot.slane %v3106_v51, 4  ;;  %4067 = vrcp.f32 %v2909_v10 }
0x11f6   :  { %v3108_v56 = vadd.f32 %v3107_v55, %v3106_v51 }
0x11f8   :  { %v3109_v57 = vrot.slane %v3108_v56, 2 }
0x11fa   :  { %v3110_v58 = vadd.f32 %v3109_v57, %v3108_v56 }
0x11fc   :  { %v3111_v60 = vrot.slane %v3110_v58, 1 }
0x11fe   :  { %v3112_v62 = vadd.f32 %v3111_v60, %v3110_v58  ;;  %v4068_v11 = vpop.eup %4067 }
0x1200   :  { %vm3113_vm11 = vcmp.gt.f32.partialorder %v3112_v62, 0.0 }
0x1201   :  { %v3215_v6 = vsel %vm3113_vm11, 1.0, %v4072_v8 }
0x1202   :  { %v3116_v7 = vsel %vm195_vm3, %v3215_v6, 0.0 }
0x1218   :  { %v3001_v1 = vpop.f32.mrb[38].mxu0 }
0x1219   :  { %v3805_v3 = vpop.f32.mrb[39].mxu0  ;;  %v3005_v5 = vsel %vm2365_vm5, %v3001_v1, 0.0 }
0x121a   :  { %3006 = vadd.xlane.f32.xlu0 %v3005_v5 }
0x121e   :  { %3117 = vadd.xlane.f32.xlu0 %v3116_v7 }
0x1234   :  { %2913 = vrot.lane.b32.xlu0 %v4068_v11, %s4073_s24  ;;  %s4076_s24 = smov 72  }
0x12a7   :  { %v3007_v13 = vpop.xlane.xlu0 %3006 }
0x12a8   :  { %v3008_v21 = vrot.slane %v3007_v13, 4 }
0x12aa   :  { %v3009_v22 = vadd.f32 %v3008_v21, %v3007_v13 }
0x12ab   :  { %v3118_v24 = vpop.xlane.xlu0 %3117 }
0x12ac   :  { %v3010_v25 = vrot.slane %v3009_v22, 2  ;;  %v3120_v12 = vmul.f32 0.125, %v3118_v24 }
0x12ae   :  { %v3011_v26 = vadd.f32 %v3010_v25, %v3009_v22  ;;  %v3123_v31 = vsel %vm3122_vm13, %v3120_v12, 0.0 }
0x12af   :  { %v2914_v27 = vpop.permute.xlu0 %2913 }
0x12b0   :  { %v3012_v28 = vrot.slane %v3011_v26, 1  ;;  %2917 = vst.msk [vmem:[%s4810_s5] sm:$0xff] %vm2916_vm12, %v2914_v27 }
0x12b2   :  { %v3013_v8 = vadd.f32 %v3012_v28, %v3011_v26 }
0x12b4   :  { %v3210_v29 = vadd.f32 -8.0, %v3013_v8 }
0x12b6   :  { %v3016_v4 = vmul.f32 0.017857144, %v3210_v29 }
0x12b8   :  { %v3017_v30 = vsub.f32 1.0, %v3016_v4 }
0x12ba   :  { %v3124_v15 = vsel %vm3121_vm14, %v3017_v30, %v3123_v31 }
0x12bb   :  { %3126 = vrot.lane.b32.xlu1 %v3124_v15, %s4076_s24 }
0x132d   :  { %v3127_v14 = vpop.permute.xlu1 %3126 }
0x132e   :  { %3130 = vst.msk [vmem:[%s4810_s5] sm:$0x1] %vm3129_vm15, %v3127_v14 }

</bundles_post_ra>
